<compile_context>
chip_gen: v7x
topology: tpu7x:2x2x1
jax: 0.10.0
libtpu: 0.0.40
codegen_flags: <defaults>
</compile_context>

<pallas_src>
import functools

import jax
import jax.numpy as jnp
from jax.experimental import pallas as pl
from jax.experimental.pallas import tpu as pltpu


def _soft_q_kernel(num_layers,
                   s_ref, a_ref, w0s_ref, w0a_ref, b0_ref,
                   wh_ref, bh_ref, wo_ref, bo_ref,
                   out_ref):
    wdt = w0s_ref.dtype  # bf16 by default -> native MXU path on v6e/v7x

    # First linear as two dots (state / action kept separate), no activation.
    h = jnp.dot(s_ref[...].astype(wdt), w0s_ref[...],
                preferred_element_type=jnp.float32)
    h = h + jnp.dot(a_ref[...].astype(wdt), w0a_ref[...],
                    preferred_element_type=jnp.float32)
    h = h + b0_ref[...]

    # Hidden stack: Linear -> ReLU (dropout = identity at inference).
    # Dot operands cast to the weight dtype; bias-add / ReLU stay f32 (VPU).
    for i in range(num_layers):
        h = jnp.dot(h.astype(wdt), wh_ref[i],
                    preferred_element_type=jnp.float32)
        h = jnp.maximum(h + bh_ref[i], 0.0)

    # Output head: VPU multiply + lane reduction (avoids an N=1 MXU matmul),
    # then one XLU transpose so the stored block is a lane-dense (1, TB) row.
    q = jnp.sum(h * wo_ref[...], axis=-1, keepdims=True) + bo_ref[...]
    out_ref[...] = jnp.transpose(q).astype(out_ref.dtype)


def pad_params(params, num_inputs, *, lane=128, dtype=jnp.bfloat16):
    """Split W0 into state/action halves; zero-pad hidden dim to `lane`.

    Matmul weights default to bf16 (2x less weight DMA, native MXU path on
    v6e/v7x); biases and the output head stay f32 since all elementwise work
    runs in f32 (v5e has no bf16 VPU).  lane=256 can help fill the 256-wide
    v6e/v7x MXU when hidden_dim is small; keep 128 on v5e (128-wide MXU).
    """
    H = params["w0"].shape[1]
    Hp = pl.cdiv(H, lane) * lane
    ph = Hp - H
    pad_last = lambda a: jnp.pad(a, [(0, 0)] * (a.ndim - 1) + [(0, ph)])
    return {
        "w0s": pad_last(params["w0"][:num_inputs]).astype(dtype),
        "w0a": pad_last(params["w0"][num_inputs:]).astype(dtype),
        "b0": pad_last(params["b0"]).astype(jnp.float32),
        "wh": jnp.pad(params["wh"],
                      ((0, 0), (0, ph), (0, ph))).astype(dtype),
        "bh": pad_last(params["bh"]).astype(jnp.float32),
        "wo": pad_last(params["wo"].T).astype(jnp.float32),   # (1, Hp)
        "bo": params["bo"].astype(jnp.float32),               # (1, 1)
    }


def soft_q_forward(state, action, padded_params, *, num_layers, tile_b=512,
                   core_parallel=False):
    """Whole MLP in one pallas_call; 1-D batch grid, weights VMEM-resident.

    tile_b (256-512, multiple of 128) is the main tuning knob: the MLP is
    tiny, so the kernel is grid-step / DMA overhead bound and fat batch tiles
    amortize it.  core_parallel=True uses pltpu.CORE_PARALLEL for v7x's two
    TensorCores (opt-in; plain PARALLEL is the safe default on 1-TC chips).
    """
    assert tile_b % 128 == 0, "tile_b must be a multiple of 128"
    B = state.shape[0]
    ns, na = state.shape[1], action.shape[1]

    # Batch tiling.
    #  * big batches: tile_b-sized tiles (>=2 grid steps).
    #  * mid batches (256 <= B < 2*tile_b): split into two tiles so both v7x
    #    TensorCores get a block; the extra ~0.35us step on 1-TC chips is noise.
    #  * small batches: one sublane-rounded block.
    #  Padding an odd step count up to even is deliberately NOT done: v7x
    #  wall-time is ceil(nblk/2) steps either way, so it would only add work.
    if B >= 2 * tile_b:
        TB = tile_b
    elif B >= 256:
        TB = pl.cdiv(pl.cdiv(B, 2), 128) * 128
    else:
        TB = max(8, pl.cdiv(B, 8) * 8)
    nblk = pl.cdiv(B, TB)
    Bp = nblk * TB

    if Bp != B:
        state = jnp.pad(state, ((0, Bp - B), (0, 0)))
        action = jnp.pad(action, ((0, Bp - B), (0, 0)))
    state = state.astype(jnp.float32)
    action = action.astype(jnp.float32)

    p = padded_params
    Hp = p["b0"].shape[-1]
    kernel = functools.partial(_soft_q_kernel, num_layers)
    weight_keys = ("w0s", "w0a", "b0", "wh", "bh", "wo", "bo")

    nbytes = lambda a: a.size * a.dtype.itemsize
    weight_bytes = sum(nbytes(p[k]) for k in weight_keys)
    io_bytes = Bp * (ns + na) * 4 + Bp * 4
    cost = pl.CostEstimate(
        flops=2 * Bp * Hp * (ns + na + num_layers * Hp) + 2 * Bp * Hp,
        transcendentals=0,
        bytes_accessed=io_bytes + weight_bytes)

    semantics = (pltpu.CORE_PARALLEL,) if core_parallel else (pltpu.PARALLEL,)

    def resident(a, buffers):
        # Constant block index -> DMA'd once, stays VMEM-resident.
        nd = a.ndim
        if buffers is None:
            return pl.BlockSpec(a.shape, lambda b, _n=nd: (0,) * _n)
        return pl.BlockSpec(a.shape, lambda b, _n=nd: (0,) * _n,
                            pipeline_mode=pl.Buffered(buffers))

    def run(weight_buffers):
        wbuf = 1 if weight_buffers == 1 else 2
        vmem_need = (wbuf * weight_bytes            # resident weight stack
                     + 2 * TB * (ns + na) * 4       # double-buffered input tiles
                     + 2 * TB * 4                   # double-buffered output tiles
                     + 2 * TB * Hp * 4)             # in-flight hidden activations
        vmem_limit = int(vmem_need) + (8 << 20)     # compiler-scratch headroom
        return pl.pallas_call(
            kernel,
            out_shape=jax.ShapeDtypeStruct((nblk, TB), jnp.float32),
            grid=(nblk,),
            in_specs=[
                pl.BlockSpec((TB, ns), lambda b: (b, 0)),
                pl.BlockSpec((TB, na), lambda b: (b, 0)),
            ] + [resident(p[k], weight_buffers) for k in weight_keys],
            out_specs=pl.BlockSpec((1, TB), lambda b: (b, 0)),
            compiler_params=pltpu.CompilerParams(
                dimension_semantics=semantics,
                vmem_limit_bytes=vmem_limit),
            cost_estimate=cost,
        )(state, action, *[p[k] for k in weight_keys])

    try:
        out = run(1)      # single-buffer the constant-index weights
    except Exception:     # fallback: default double-buffering (older Pallas)
        out = run(None)

    return out.reshape(Bp, 1)[:B]


def init_params(key, num_inputs, num_actions, hidden_dim, num_layers,
                init_w=0.003):
    """Uniform(-init_w, init_w) init matching the PyTorch module shapes."""
    d_in = num_inputs + num_actions
    ks = jax.random.split(key, 6)
    u = lambda k, shape: jax.random.uniform(
        k, shape, dtype=jnp.float32, minval=-init_w, maxval=init_w)
    return {
        "w0": u(ks[0], (d_in, hidden_dim)),
        "b0": u(ks[1], (1, hidden_dim)),
        "wh": u(ks[2], (num_layers, hidden_dim, hidden_dim)),
        "bh": u(ks[3], (num_layers, 1, hidden_dim)),
        "wo": u(ks[4], (hidden_dim, 1)),
        "bo": u(ks[5], (1, 1)),
    }


def reference_forward(state, action, params, *, num_layers):
    """Pure-JAX reference (unpadded f32 params) for correctness checking."""
    x = jnp.concatenate([state, action], axis=-1).astype(jnp.float32)
    h = x @ params["w0"] + params["b0"]
    for i in range(num_layers):
        h = jnp.maximum(h @ params["wh"][i] + params["bh"][i], 0.0)
    return h @ params["wo"] + params["bo"]


if __name__ == "__main__":
    num_inputs, num_actions, hidden_dim, num_layers = 24, 8, 32, 6
    batch = 2

    key = jax.random.PRNGKey(0)
    k_params, k_state, k_action = jax.random.split(key, 3)

    params = init_params(k_params, num_inputs, num_actions, hidden_dim,
                         num_layers)
    state = jax.random.normal(k_state, (batch, num_inputs), dtype=jnp.float32)
    action = jax.random.normal(k_action, (batch, num_actions),
                               dtype=jnp.float32)

    q_ref = reference_forward(state, action, params, num_layers=num_layers)

    # f32 weight path: exact check against the pure-JAX reference.
    padded_f32 = pad_params(params, num_inputs, dtype=jnp.float32)
    q32 = jax.block_until_ready(
        soft_q_forward(state, action, padded_f32, num_layers=num_layers))
    assert q32.shape == (batch, 1)
    assert jnp.allclose(q32, q_ref, atol=1e-5, rtol=1e-5), (q32, q_ref)

    # bf16 weight path (default; fast MXU path on v6e/v7x): looser tolerance.
    padded_bf16 = pad_params(params, num_inputs)
    q16 = jax.block_until_ready(
        soft_q_forward(state, action, padded_bf16, num_layers=num_layers))
    assert q16.shape == (batch, 1)
    assert jnp.allclose(q16, q_ref, atol=1e-3, rtol=1e-2), (q16, q_ref)

    print("KERNEL_OK")
</pallas_src>

<mosaic_0001>
module attributes {stable_mosaic.version = 11 : i64} {
  func.func @_soft_q_kernel(%arg0: i32, %arg1: memref<8x24xf32, #tpu.memory_space<vmem>>, %arg2: memref<8x8xf32, #tpu.memory_space<vmem>>, %arg3: memref<24x128xf32, #tpu.memory_space<vmem>>, %arg4: memref<8x128xf32, #tpu.memory_space<vmem>>, %arg5: memref<1x128xf32, #tpu.memory_space<vmem>>, %arg6: memref<6x128x128xf32, #tpu.memory_space<vmem>>, %arg7: memref<6x1x128xf32, #tpu.memory_space<vmem>>, %arg8: memref<1x128xf32, #tpu.memory_space<vmem>>, %arg9: memref<1x1xf32, #tpu.memory_space<vmem>>, %arg10: memref<1x8xf32, #tpu.memory_space<vmem>>) attributes {dimension_semantics = [#tpu.dimension_semantics<parallel>], iteration_bounds = array<i64: 1>, scalar_prefetch = 0 : i64, scratch_operands = 0 : i64, tpu.core_type = #tpu.core_type<tc>, window_params = [{transform_indices = @transform_0, window_bounds = array<i64: 8, 24>}, {transform_indices = @transform_1, window_bounds = array<i64: 8, 8>}, {pipeline_mode = #tpu.pipeline_mode<synchronous>, transform_indices = @transform_2, window_bounds = array<i64: 24, 128>}, {pipeline_mode = #tpu.pipeline_mode<synchronous>, transform_indices = @transform_3, window_bounds = array<i64: 8, 128>}, {pipeline_mode = #tpu.pipeline_mode<synchronous>, transform_indices = @transform_4, window_bounds = array<i64: 1, 128>}, {pipeline_mode = #tpu.pipeline_mode<synchronous>, transform_indices = @transform_5, window_bounds = array<i64: 6, 128, 128>}, {pipeline_mode = #tpu.pipeline_mode<synchronous>, transform_indices = @transform_6, window_bounds = array<i64: 6, 1, 128>}, {pipeline_mode = #tpu.pipeline_mode<synchronous>, transform_indices = @transform_7, window_bounds = array<i64: 1, 128>}, {pipeline_mode = #tpu.pipeline_mode<synchronous>, transform_indices = @transform_8, window_bounds = array<i64: 1, 1>}, {transform_indices = @transform_9, window_bounds = array<i64: 1, 8>}]} {
    %c0 = arith.constant 0 : index
    %c0_0 = arith.constant 0 : index
    %0 = vector.load %arg1[%c0, %c0_0] : memref<8x24xf32, #tpu.memory_space<vmem>>, vector<8x24xf32>
    %c0_1 = arith.constant 0 : index
    %c0_2 = arith.constant 0 : index
    %1 = vector.load %arg3[%c0_1, %c0_2] : memref<24x128xf32, #tpu.memory_space<vmem>>, vector<24x128xf32>
    %cst = arith.constant dense<0.000000e+00> : vector<8x128xf32>
    %2 = tpu.matmul %0, %1, %cst {dimension_numbers = #tpu.dot_dimension_numbers<[1], [0], [0], [1], [0, 0, 1, 1], [], []>} : vector<8x24xf32>, vector<24x128xf32>, vector<8x128xf32> -> vector<8x128xf32>
    %c0_3 = arith.constant 0 : index
    %c0_4 = arith.constant 0 : index
    %3 = vector.load %arg2[%c0_3, %c0_4] : memref<8x8xf32, #tpu.memory_space<vmem>>, vector<8x8xf32>
    %c0_5 = arith.constant 0 : index
    %c0_6 = arith.constant 0 : index
    %4 = vector.load %arg4[%c0_5, %c0_6] : memref<8x128xf32, #tpu.memory_space<vmem>>, vector<8x128xf32>
    %cst_7 = arith.constant dense<0.000000e+00> : vector<8x128xf32>
    %5 = tpu.matmul %3, %4, %cst_7 {dimension_numbers = #tpu.dot_dimension_numbers<[1], [0], [0], [1], [0, 0, 1, 1], [], []>} : vector<8x8xf32>, vector<8x128xf32>, vector<8x128xf32> -> vector<8x128xf32>
    %6 = arith.addf %2, %5 : vector<8x128xf32>
    %c0_8 = arith.constant 0 : index
    %c0_9 = arith.constant 0 : index
    %7 = vector.load %arg5[%c0_8, %c0_9] : memref<1x128xf32, #tpu.memory_space<vmem>>, vector<1x128xf32>
    %8 = vector.broadcast %7 : vector<1x128xf32> to vector<8x128xf32>
    %9 = arith.addf %6, %8 : vector<8x128xf32>
    %c0_10 = arith.constant 0 : index
    %c0_11 = arith.constant 0 : index
    %c0_12 = arith.constant 0 : index
    %10 = vector.load %arg6[%c0_10, %c0_11, %c0_12] : memref<6x128x128xf32, #tpu.memory_space<vmem>>, vector<1x128x128xf32>
    %11 = vector.shape_cast %10 : vector<1x128x128xf32> to vector<128x128xf32>
    %cst_13 = arith.constant dense<0.000000e+00> : vector<8x128xf32>
    %12 = tpu.matmul %9, %11, %cst_13 {dimension_numbers = #tpu.dot_dimension_numbers<[1], [0], [0], [1], [0, 0, 1, 1], [], []>} : vector<8x128xf32>, vector<128x128xf32>, vector<8x128xf32> -> vector<8x128xf32>
    %c0_14 = arith.constant 0 : index
    %c0_15 = arith.constant 0 : index
    %c0_16 = arith.constant 0 : index
    %13 = vector.load %arg7[%c0_14, %c0_15, %c0_16] : memref<6x1x128xf32, #tpu.memory_space<vmem>>, vector<1x1x128xf32>
    %14 = vector.shape_cast %13 : vector<1x1x128xf32> to vector<1x128xf32>
    %15 = vector.broadcast %14 : vector<1x128xf32> to vector<8x128xf32>
    %16 = arith.addf %12, %15 : vector<8x128xf32>
    %cst_17 = arith.constant 0.000000e+00 : f32
    %17 = vector.broadcast %cst_17 : f32 to vector<8x128xf32>
    %18 = arith.maximumf %16, %17 : vector<8x128xf32>
    %c1 = arith.constant 1 : index
    %c0_18 = arith.constant 0 : index
    %c0_19 = arith.constant 0 : index
    %19 = vector.load %arg6[%c1, %c0_18, %c0_19] : memref<6x128x128xf32, #tpu.memory_space<vmem>>, vector<1x128x128xf32>
    %20 = vector.shape_cast %19 : vector<1x128x128xf32> to vector<128x128xf32>
    %cst_20 = arith.constant dense<0.000000e+00> : vector<8x128xf32>
    %21 = tpu.matmul %18, %20, %cst_20 {dimension_numbers = #tpu.dot_dimension_numbers<[1], [0], [0], [1], [0, 0, 1, 1], [], []>} : vector<8x128xf32>, vector<128x128xf32>, vector<8x128xf32> -> vector<8x128xf32>
    %c1_21 = arith.constant 1 : index
    %c0_22 = arith.constant 0 : index
    %c0_23 = arith.constant 0 : index
    %22 = vector.load %arg7[%c1_21, %c0_22, %c0_23] : memref<6x1x128xf32, #tpu.memory_space<vmem>>, vector<1x1x128xf32>
    %23 = vector.shape_cast %22 : vector<1x1x128xf32> to vector<1x128xf32>
    %24 = vector.broadcast %23 : vector<1x128xf32> to vector<8x128xf32>
    %25 = arith.addf %21, %24 : vector<8x128xf32>
    %cst_24 = arith.constant 0.000000e+00 : f32
    %26 = vector.broadcast %cst_24 : f32 to vector<8x128xf32>
    %27 = arith.maximumf %25, %26 : vector<8x128xf32>
    %c2 = arith.constant 2 : index
    %c0_25 = arith.constant 0 : index
    %c0_26 = arith.constant 0 : index
    %28 = vector.load %arg6[%c2, %c0_25, %c0_26] : memref<6x128x128xf32, #tpu.memory_space<vmem>>, vector<1x128x128xf32>
    %29 = vector.shape_cast %28 : vector<1x128x128xf32> to vector<128x128xf32>
    %cst_27 = arith.constant dense<0.000000e+00> : vector<8x128xf32>
    %30 = tpu.matmul %27, %29, %cst_27 {dimension_numbers = #tpu.dot_dimension_numbers<[1], [0], [0], [1], [0, 0, 1, 1], [], []>} : vector<8x128xf32>, vector<128x128xf32>, vector<8x128xf32> -> vector<8x128xf32>
    %c2_28 = arith.constant 2 : index
    %c0_29 = arith.constant 0 : index
    %c0_30 = arith.constant 0 : index
    %31 = vector.load %arg7[%c2_28, %c0_29, %c0_30] : memref<6x1x128xf32, #tpu.memory_space<vmem>>, vector<1x1x128xf32>
    %32 = vector.shape_cast %31 : vector<1x1x128xf32> to vector<1x128xf32>
    %33 = vector.broadcast %32 : vector<1x128xf32> to vector<8x128xf32>
    %34 = arith.addf %30, %33 : vector<8x128xf32>
    %cst_31 = arith.constant 0.000000e+00 : f32
    %35 = vector.broadcast %cst_31 : f32 to vector<8x128xf32>
    %36 = arith.maximumf %34, %35 : vector<8x128xf32>
    %c3 = arith.constant 3 : index
    %c0_32 = arith.constant 0 : index
    %c0_33 = arith.constant 0 : index
    %37 = vector.load %arg6[%c3, %c0_32, %c0_33] : memref<6x128x128xf32, #tpu.memory_space<vmem>>, vector<1x128x128xf32>
    %38 = vector.shape_cast %37 : vector<1x128x128xf32> to vector<128x128xf32>
    %cst_34 = arith.constant dense<0.000000e+00> : vector<8x128xf32>
    %39 = tpu.matmul %36, %38, %cst_34 {dimension_numbers = #tpu.dot_dimension_numbers<[1], [0], [0], [1], [0, 0, 1, 1], [], []>} : vector<8x128xf32>, vector<128x128xf32>, vector<8x128xf32> -> vector<8x128xf32>
    %c3_35 = arith.constant 3 : index
    %c0_36 = arith.constant 0 : index
    %c0_37 = arith.constant 0 : index
    %40 = vector.load %arg7[%c3_35, %c0_36, %c0_37] : memref<6x1x128xf32, #tpu.memory_space<vmem>>, vector<1x1x128xf32>
    %41 = vector.shape_cast %40 : vector<1x1x128xf32> to vector<1x128xf32>
    %42 = vector.broadcast %41 : vector<1x128xf32> to vector<8x128xf32>
    %43 = arith.addf %39, %42 : vector<8x128xf32>
    %cst_38 = arith.constant 0.000000e+00 : f32
    %44 = vector.broadcast %cst_38 : f32 to vector<8x128xf32>
    %45 = arith.maximumf %43, %44 : vector<8x128xf32>
    %c4 = arith.constant 4 : index
    %c0_39 = arith.constant 0 : index
    %c0_40 = arith.constant 0 : index
    %46 = vector.load %arg6[%c4, %c0_39, %c0_40] : memref<6x128x128xf32, #tpu.memory_space<vmem>>, vector<1x128x128xf32>
    %47 = vector.shape_cast %46 : vector<1x128x128xf32> to vector<128x128xf32>
    %cst_41 = arith.constant dense<0.000000e+00> : vector<8x128xf32>
    %48 = tpu.matmul %45, %47, %cst_41 {dimension_numbers = #tpu.dot_dimension_numbers<[1], [0], [0], [1], [0, 0, 1, 1], [], []>} : vector<8x128xf32>, vector<128x128xf32>, vector<8x128xf32> -> vector<8x128xf32>
    %c4_42 = arith.constant 4 : index
    %c0_43 = arith.constant 0 : index
    %c0_44 = arith.constant 0 : index
    %49 = vector.load %arg7[%c4_42, %c0_43, %c0_44] : memref<6x1x128xf32, #tpu.memory_space<vmem>>, vector<1x1x128xf32>
    %50 = vector.shape_cast %49 : vector<1x1x128xf32> to vector<1x128xf32>
    %51 = vector.broadcast %50 : vector<1x128xf32> to vector<8x128xf32>
    %52 = arith.addf %48, %51 : vector<8x128xf32>
    %cst_45 = arith.constant 0.000000e+00 : f32
    %53 = vector.broadcast %cst_45 : f32 to vector<8x128xf32>
    %54 = arith.maximumf %52, %53 : vector<8x128xf32>
    %c5 = arith.constant 5 : index
    %c0_46 = arith.constant 0 : index
    %c0_47 = arith.constant 0 : index
    %55 = vector.load %arg6[%c5, %c0_46, %c0_47] : memref<6x128x128xf32, #tpu.memory_space<vmem>>, vector<1x128x128xf32>
    %56 = vector.shape_cast %55 : vector<1x128x128xf32> to vector<128x128xf32>
    %cst_48 = arith.constant dense<0.000000e+00> : vector<8x128xf32>
    %57 = tpu.matmul %54, %56, %cst_48 {dimension_numbers = #tpu.dot_dimension_numbers<[1], [0], [0], [1], [0, 0, 1, 1], [], []>} : vector<8x128xf32>, vector<128x128xf32>, vector<8x128xf32> -> vector<8x128xf32>
    %c5_49 = arith.constant 5 : index
    %c0_50 = arith.constant 0 : index
    %c0_51 = arith.constant 0 : index
    %58 = vector.load %arg7[%c5_49, %c0_50, %c0_51] : memref<6x1x128xf32, #tpu.memory_space<vmem>>, vector<1x1x128xf32>
    %59 = vector.shape_cast %58 : vector<1x1x128xf32> to vector<1x128xf32>
    %60 = vector.broadcast %59 : vector<1x128xf32> to vector<8x128xf32>
    %61 = arith.addf %57, %60 : vector<8x128xf32>
    %cst_52 = arith.constant 0.000000e+00 : f32
    %62 = vector.broadcast %cst_52 : f32 to vector<8x128xf32>
    %63 = arith.maximumf %61, %62 : vector<8x128xf32>
    %c0_53 = arith.constant 0 : index
    %c0_54 = arith.constant 0 : index
    %64 = vector.load %arg8[%c0_53, %c0_54] : memref<1x128xf32, #tpu.memory_space<vmem>>, vector<1x128xf32>
    %65 = vector.broadcast %64 : vector<1x128xf32> to vector<8x128xf32>
    %66 = arith.mulf %63, %65 : vector<8x128xf32>
    %cst_55 = arith.constant dense<0.000000e+00> : vector<8xf32>
    %67 = vector.multi_reduction <add>, %66, %cst_55 [1] : vector<8x128xf32> to vector<8xf32>
    %68 = vector.shape_cast %67 : vector<8xf32> to vector<8x1xf32>
    %c0_56 = arith.constant 0 : index
    %c0_57 = arith.constant 0 : index
    %69 = vector.load %arg9[%c0_56, %c0_57] : memref<1x1xf32, #tpu.memory_space<vmem>>, vector<1x1xf32>
    %70 = vector.broadcast %69 : vector<1x1xf32> to vector<8x1xf32>
    %71 = arith.addf %68, %70 : vector<8x1xf32>
    %72 = tpu.transpose %71, [1, 0] : vector<8x1xf32> -> vector<1x8xf32>
    %c0_58 = arith.constant 0 : index
    %c0_59 = arith.constant 0 : index
    %73 = vector.load %arg10[%c0_58, %c0_59] : memref<1x8xf32, #tpu.memory_space<vmem>>, vector<1x8xf32>
    tpu.vector_store %arg10[%c0_58, %c0_59], %72 {strides = array<i32>} : memref<1x8xf32, #tpu.memory_space<vmem>>, vector<1x8xf32>,
    return
  }
  func.func @transform_0(%arg0: i32) -> (i32, i32) {
    %c0_i32 = arith.constant 0 : i32
    %c0_i32_0 = arith.constant 0 : i32
    return %arg0, %c0_i32 : i32, i32
  }
  func.func @transform_1(%arg0: i32) -> (i32, i32) {
    %c0_i32 = arith.constant 0 : i32
    %c0_i32_0 = arith.constant 0 : i32
    return %arg0, %c0_i32 : i32, i32
  }
  func.func @transform_2(%arg0: i32) -> (i32, i32) {
    %c0_i32 = arith.constant 0 : i32
    %c0_i32_0 = arith.constant 0 : i32
    %c0_i32_1 = arith.constant 0 : i32
    return %c0_i32, %c0_i32_0 : i32, i32
  }
  func.func @transform_3(%arg0: i32) -> (i32, i32) {
    %c0_i32 = arith.constant 0 : i32
    %c0_i32_0 = arith.constant 0 : i32
    %c0_i32_1 = arith.constant 0 : i32
    return %c0_i32, %c0_i32_0 : i32, i32
  }
  func.func @transform_4(%arg0: i32) -> (i32, i32) {
    %c0_i32 = arith.constant 0 : i32
    %c0_i32_0 = arith.constant 0 : i32
    %c0_i32_1 = arith.constant 0 : i32
    return %c0_i32, %c0_i32_0 : i32, i32
  }
  func.func @transform_5(%arg0: i32) -> (i32, i32, i32) {
    %c0_i32 = arith.constant 0 : i32
    %c0_i32_0 = arith.constant 0 : i32
    %c0_i32_1 = arith.constant 0 : i32
    %c0_i32_2 = arith.constant 0 : i32
    return %c0_i32, %c0_i32_0, %c0_i32_1 : i32, i32, i32
  }
  func.func @transform_6(%arg0: i32) -> (i32, i32, i32) {
    %c0_i32 = arith.constant 0 : i32
    %c0_i32_0 = arith.constant 0 : i32
    %c0_i32_1 = arith.constant 0 : i32
    %c0_i32_2 = arith.constant 0 : i32
    return %c0_i32, %c0_i32_0, %c0_i32_1 : i32, i32, i32
  }
  func.func @transform_7(%arg0: i32) -> (i32, i32) {
    %c0_i32 = arith.constant 0 : i32
    %c0_i32_0 = arith.constant 0 : i32
    %c0_i32_1 = arith.constant 0 : i32
    return %c0_i32, %c0_i32_0 : i32, i32
  }
  func.func @transform_8(%arg0: i32) -> (i32, i32) {
    %c0_i32 = arith.constant 0 : i32
    %c0_i32_0 = arith.constant 0 : i32
    %c0_i32_1 = arith.constant 0 : i32
    return %c0_i32, %c0_i32_0 : i32, i32
  }
  func.func @transform_9(%arg0: i32) -> (i32, i32) {
    %c0_i32 = arith.constant 0 : i32
    %c0_i32_0 = arith.constant 0 : i32
    return %arg0, %c0_i32 : i32, i32
  }
}

module attributes {stable_mosaic.version = 11 : i64} {
  func.func @_soft_q_kernel(%arg0: i32, %arg1: memref<8x24xf32, #tpu.memory_space<vmem>>, %arg2: memref<8x8xf32, #tpu.memory_space<vmem>>, %arg3: memref<24x128xf32, #tpu.memory_space<vmem>>, %arg4: memref<8x128xf32, #tpu.memory_space<vmem>>, %arg5: memref<1x128xf32, #tpu.memory_space<vmem>>, %arg6: memref<6x128x128xf32, #tpu.memory_space<vmem>>, %arg7: memref<6x1x128xf32, #tpu.memory_space<vmem>>, %arg8: memref<1x128xf32, #tpu.memory_space<vmem>>, %arg9: memref<1x1xf32, #tpu.memory_space<vmem>>, %arg10: memref<1x8xf32, #tpu.memory_space<vmem>>) attributes {dimension_semantics = [#tpu.dimension_semantics<parallel>], iteration_bounds = array<i64: 1>, scalar_prefetch = 0 : i64, scratch_operands = 0 : i64, tpu.core_type = #tpu.core_type<tc>, window_params = [{transform_indices = @transform_0, window_bounds = array<i64: 8, 24>}, {transform_indices = @transform_1, window_bounds = array<i64: 8, 8>}, {pipeline_mode = #tpu.pipeline_mode<synchronous>, transform_indices = @transform_2, window_bounds = array<i64: 24, 128>}, {pipeline_mode = #tpu.pipeline_mode<synchronous>, transform_indices = @transform_3, window_bounds = array<i64: 8, 128>}, {pipeline_mode = #tpu.pipeline_mode<synchronous>, transform_indices = @transform_4, window_bounds = array<i64: 1, 128>}, {pipeline_mode = #tpu.pipeline_mode<synchronous>, transform_indices = @transform_5, window_bounds = array<i64: 6, 128, 128>}, {pipeline_mode = #tpu.pipeline_mode<synchronous>, transform_indices = @transform_6, window_bounds = array<i64: 6, 1, 128>}, {pipeline_mode = #tpu.pipeline_mode<synchronous>, transform_indices = @transform_7, window_bounds = array<i64: 1, 128>}, {pipeline_mode = #tpu.pipeline_mode<synchronous>, transform_indices = @transform_8, window_bounds = array<i64: 1, 1>}, {transform_indices = @transform_9, window_bounds = array<i64: 1, 8>}]} {
    %c0 = arith.constant 0 : index
    %c0_0 = arith.constant 0 : index
    %0 = vector.load %arg1[%c0, %c0_0] : memref<8x24xf32, #tpu.memory_space<vmem>>, vector<8x24xf32>
    %c0_1 = arith.constant 0 : index
    %c0_2 = arith.constant 0 : index
    %1 = vector.load %arg3[%c0_1, %c0_2] : memref<24x128xf32, #tpu.memory_space<vmem>>, vector<24x128xf32>
    %cst = arith.constant dense<0.000000e+00> : vector<8x128xf32>
    %2 = tpu.matmul %0, %1, %cst {dimension_numbers = #tpu.dot_dimension_numbers<[1], [0], [0], [1], [0, 0, 1, 1], [], []>} : vector<8x24xf32>, vector<24x128xf32>, vector<8x128xf32> -> vector<8x128xf32>
    %c0_3 = arith.constant 0 : index
    %c0_4 = arith.constant 0 : index
    %3 = vector.load %arg2[%c0_3, %c0_4] : memref<8x8xf32, #tpu.memory_space<vmem>>, vector<8x8xf32>
    %c0_5 = arith.constant 0 : index
    %c0_6 = arith.constant 0 : index
    %4 = vector.load %arg4[%c0_5, %c0_6] : memref<8x128xf32, #tpu.memory_space<vmem>>, vector<8x128xf32>
    %cst_7 = arith.constant dense<0.000000e+00> : vector<8x128xf32>
    %5 = tpu.matmul %3, %4, %cst_7 {dimension_numbers = #tpu.dot_dimension_numbers<[1], [0], [0], [1], [0, 0, 1, 1], [], []>} : vector<8x8xf32>, vector<8x128xf32>, vector<8x128xf32> -> vector<8x128xf32>
    %6 = arith.addf %2, %5 : vector<8x128xf32>
    %c0_8 = arith.constant 0 : index
    %c0_9 = arith.constant 0 : index
    %7 = vector.load %arg5[%c0_8, %c0_9] : memref<1x128xf32, #tpu.memory_space<vmem>>, vector<1x128xf32>
    %8 = vector.broadcast %7 : vector<1x128xf32> to vector<8x128xf32>
    %9 = arith.addf %6, %8 : vector<8x128xf32>
    %c0_10 = arith.constant 0 : index
    %c0_11 = arith.constant 0 : index
    %c0_12 = arith.constant 0 : index
    %10 = vector.load %arg6[%c0_10, %c0_11, %c0_12] : memref<6x128x128xf32, #tpu.memory_space<vmem>>, vector<1x128x128xf32>
    %11 = vector.shape_cast %10 : vector<1x128x128xf32> to vector<128x128xf32>
    %cst_13 = arith.constant dense<0.000000e+00> : vector<8x128xf32>
    %12 = tpu.matmul %9, %11, %cst_13 {dimension_numbers = #tpu.dot_dimension_numbers<[1], [0], [0], [1], [0, 0, 1, 1], [], []>} : vector<8x128xf32>, vector<128x128xf32>, vector<8x128xf32> -> vector<8x128xf32>
    %c0_14 = arith.constant 0 : index
    %c0_15 = arith.constant 0 : index
    %c0_16 = arith.constant 0 : index
    %13 = vector.load %arg7[%c0_14, %c0_15, %c0_16] : memref<6x1x128xf32, #tpu.memory_space<vmem>>, vector<1x1x128xf32>
    %14 = vector.shape_cast %13 : vector<1x1x128xf32> to vector<1x128xf32>
    %15 = vector.broadcast %14 : vector<1x128xf32> to vector<8x128xf32>
    %16 = arith.addf %12, %15 : vector<8x128xf32>
    %cst_17 = arith.constant 0.000000e+00 : f32
    %17 = vector.broadcast %cst_17 : f32 to vector<8x128xf32>
    %18 = arith.maximumf %16, %17 : vector<8x128xf32>
    %c1 = arith.constant 1 : index
    %c0_18 = arith.constant 0 : index
    %c0_19 = arith.constant 0 : index
    %19 = vector.load %arg6[%c1, %c0_18, %c0_19] : memref<6x128x128xf32, #tpu.memory_space<vmem>>, vector<1x128x128xf32>
    %20 = vector.shape_cast %19 : vector<1x128x128xf32> to vector<128x128xf32>
    %cst_20 = arith.constant dense<0.000000e+00> : vector<8x128xf32>
    %21 = tpu.matmul %18, %20, %cst_20 {dimension_numbers = #tpu.dot_dimension_numbers<[1], [0], [0], [1], [0, 0, 1, 1], [], []>} : vector<8x128xf32>, vector<128x128xf32>, vector<8x128xf32> -> vector<8x128xf32>
    %c1_21 = arith.constant 1 : index
    %c0_22 = arith.constant 0 : index
    %c0_23 = arith.constant 0 : index
    %22 = vector.load %arg7[%c1_21, %c0_22, %c0_23] : memref<6x1x128xf32, #tpu.memory_space<vmem>>, vector<1x1x128xf32>
    %23 = vector.shape_cast %22 : vector<1x1x128xf32> to vector<1x128xf32>
    %24 = vector.broadcast %23 : vector<1x128xf32> to vector<8x128xf32>
    %25 = arith.addf %21, %24 : vector<8x128xf32>
    %cst_24 = arith.constant 0.000000e+00 : f32
    %26 = vector.broadcast %cst_24 : f32 to vector<8x128xf32>
    %27 = arith.maximumf %25, %26 : vector<8x128xf32>
    %c2 = arith.constant 2 : index
    %c0_25 = arith.constant 0 : index
    %c0_26 = arith.constant 0 : index
    %28 = vector.load %arg6[%c2, %c0_25, %c0_26] : memref<6x128x128xf32, #tpu.memory_space<vmem>>, vector<1x128x128xf32>
    %29 = vector.shape_cast %28 : vector<1x128x128xf32> to vector<128x128xf32>
    %cst_27 = arith.constant dense<0.000000e+00> : vector<8x128xf32>
    %30 = tpu.matmul %27, %29, %cst_27 {dimension_numbers = #tpu.dot_dimension_numbers<[1], [0], [0], [1], [0, 0, 1, 1], [], []>} : vector<8x128xf32>, vector<128x128xf32>, vector<8x128xf32> -> vector<8x128xf32>
    %c2_28 = arith.constant 2 : index
    %c0_29 = arith.constant 0 : index
    %c0_30 = arith.constant 0 : index
    %31 = vector.load %arg7[%c2_28, %c0_29, %c0_30] : memref<6x1x128xf32, #tpu.memory_space<vmem>>, vector<1x1x128xf32>
    %32 = vector.shape_cast %31 : vector<1x1x128xf32> to vector<1x128xf32>
    %33 = vector.broadcast %32 : vector<1x128xf32> to vector<8x128xf32>
    %34 = arith.addf %30, %33 : vector<8x128xf32>
    %cst_31 = arith.constant 0.000000e+00 : f32
    %35 = vector.broadcast %cst_31 : f32 to vector<8x128xf32>
    %36 = arith.maximumf %34, %35 : vector<8x128xf32>
    %c3 = arith.constant 3 : index
    %c0_32 = arith.constant 0 : index
    %c0_33 = arith.constant 0 : index
    %37 = vector.load %arg6[%c3, %c0_32, %c0_33] : memref<6x128x128xf32, #tpu.memory_space<vmem>>, vector<1x128x128xf32>
    %38 = vector.shape_cast %37 : vector<1x128x128xf32> to vector<128x128xf32>
    %cst_34 = arith.constant dense<0.000000e+00> : vector<8x128xf32>
    %39 = tpu.matmul %36, %38, %cst_34 {dimension_numbers = #tpu.dot_dimension_numbers<[1], [0], [0], [1], [0, 0, 1, 1], [], []>} : vector<8x128xf32>, vector<128x128xf32>, vector<8x128xf32> -> vector<8x128xf32>
    %c3_35 = arith.constant 3 : index
    %c0_36 = arith.constant 0 : index
    %c0_37 = arith.constant 0 : index
    %40 = vector.load %arg7[%c3_35, %c0_36, %c0_37] : memref<6x1x128xf32, #tpu.memory_space<vmem>>, vector<1x1x128xf32>
    %41 = vector.shape_cast %40 : vector<1x1x128xf32> to vector<1x128xf32>
    %42 = vector.broadcast %41 : vector<1x128xf32> to vector<8x128xf32>
    %43 = arith.addf %39, %42 : vector<8x128xf32>
    %cst_38 = arith.constant 0.000000e+00 : f32
    %44 = vector.broadcast %cst_38 : f32 to vector<8x128xf32>
    %45 = arith.maximumf %43, %44 : vector<8x128xf32>
    %c4 = arith.constant 4 : index
    %c0_39 = arith.constant 0 : index
    %c0_40 = arith.constant 0 : index
    %46 = vector.load %arg6[%c4, %c0_39, %c0_40] : memref<6x128x128xf32, #tpu.memory_space<vmem>>, vector<1x128x128xf32>
    %47 = vector.shape_cast %46 : vector<1x128x128xf32> to vector<128x128xf32>
    %cst_41 = arith.constant dense<0.000000e+00> : vector<8x128xf32>
    %48 = tpu.matmul %45, %47, %cst_41 {dimension_numbers = #tpu.dot_dimension_numbers<[1], [0], [0], [1], [0, 0, 1, 1], [], []>} : vector<8x128xf32>, vector<128x128xf32>, vector<8x128xf32> -> vector<8x128xf32>
    %c4_42 = arith.constant 4 : index
    %c0_43 = arith.constant 0 : index
    %c0_44 = arith.constant 0 : index
    %49 = vector.load %arg7[%c4_42, %c0_43, %c0_44] : memref<6x1x128xf32, #tpu.memory_space<vmem>>, vector<1x1x128xf32>
    %50 = vector.shape_cast %49 : vector<1x1x128xf32> to vector<1x128xf32>
    %51 = vector.broadcast %50 : vector<1x128xf32> to vector<8x128xf32>
    %52 = arith.addf %48, %51 : vector<8x128xf32>
    %cst_45 = arith.constant 0.000000e+00 : f32
    %53 = vector.broadcast %cst_45 : f32 to vector<8x128xf32>
    %54 = arith.maximumf %52, %53 : vector<8x128xf32>
    %c5 = arith.constant 5 : index
    %c0_46 = arith.constant 0 : index
    %c0_47 = arith.constant 0 : index
    %55 = vector.load %arg6[%c5, %c0_46, %c0_47] : memref<6x128x128xf32, #tpu.memory_space<vmem>>, vector<1x128x128xf32>
    %56 = vector.shape_cast %55 : vector<1x128x128xf32> to vector<128x128xf32>
    %cst_48 = arith.constant dense<0.000000e+00> : vector<8x128xf32>
    %57 = tpu.matmul %54, %56, %cst_48 {dimension_numbers = #tpu.dot_dimension_numbers<[1], [0], [0], [1], [0, 0, 1, 1], [], []>} : vector<8x128xf32>, vector<128x128xf32>, vector<8x128xf32> -> vector<8x128xf32>
    %c5_49 = arith.constant 5 : index
    %c0_50 = arith.constant 0 : index
    %c0_51 = arith.constant 0 : index
    %58 = vector.load %arg7[%c5_49, %c0_50, %c0_51] : memref<6x1x128xf32, #tpu.memory_space<vmem>>, vector<1x1x128xf32>
    %59 = vector.shape_cast %58 : vector<1x1x128xf32> to vector<1x128xf32>
    %60 = vector.broadcast %59 : vector<1x128xf32> to vector<8x128xf32>
    %61 = arith.addf %57, %60 : vector<8x128xf32>
    %cst_52 = arith.constant 0.000000e+00 : f32
    %62 = vector.broadcast %cst_52 : f32 to vector<8x128xf32>
    %63 = arith.maximumf %61, %62 : vector<8x128xf32>
    %c0_53 = arith.constant 0 : index
    %c0_54 = arith.constant 0 : index
    %64 = vector.load %arg8[%c0_53, %c0_54] : memref<1x128xf32, #tpu.memory_space<vmem>>, vector<1x128xf32>
    %65 = vector.broadcast %64 : vector<1x128xf32> to vector<8x128xf32>
    %66 = arith.mulf %63, %65 : vector<8x128xf32>
    %cst_55 = arith.constant dense<0.000000e+00> : vector<8xf32>
    %67 = vector.multi_reduction <add>, %66, %cst_55 [1] : vector<8x128xf32> to vector<8xf32>
    %68 = vector.shape_cast %67 : vector<8xf32> to vector<8x1xf32>
    %c0_56 = arith.constant 0 : index
    %c0_57 = arith.constant 0 : index
    %69 = vector.load %arg9[%c0_56, %c0_57] : memref<1x1xf32, #tpu.memory_space<vmem>>, vector<1x1xf32>
    %70 = vector.broadcast %69 : vector<1x1xf32> to vector<8x1xf32>
    %71 = arith.addf %68, %70 : vector<8x1xf32>
    %72 = tpu.transpose %71, [1, 0] : vector<8x1xf32> -> vector<1x8xf32>
    %c0_58 = arith.constant 0 : index
    %c0_59 = arith.constant 0 : index
    %73 = vector.load %arg10[%c0_58, %c0_59] : memref<1x8xf32, #tpu.memory_space<vmem>>, vector<1x8xf32>
    tpu.vector_store %arg10[%c0_58, %c0_59], %72 {strides = array<i32>} : memref<1x8xf32, #tpu.memory_space<vmem>>, vector<1x8xf32>,
    return
  }
  func.func @transform_0(%arg0: i32) -> (i32, i32) {
    %c0_i32 = arith.constant 0 : i32
    %c0_i32_0 = arith.constant 0 : i32
    return %arg0, %c0_i32 : i32, i32
  }
  func.func @transform_1(%arg0: i32) -> (i32, i32) {
    %c0_i32 = arith.constant 0 : i32
    %c0_i32_0 = arith.constant 0 : i32
    return %arg0, %c0_i32 : i32, i32
  }
  func.func @transform_2(%arg0: i32) -> (i32, i32) {
    %c0_i32 = arith.constant 0 : i32
    %c0_i32_0 = arith.constant 0 : i32
    %c0_i32_1 = arith.constant 0 : i32
    return %c0_i32, %c0_i32_0 : i32, i32
  }
  func.func @transform_3(%arg0: i32) -> (i32, i32) {
    %c0_i32 = arith.constant 0 : i32
    %c0_i32_0 = arith.constant 0 : i32
    %c0_i32_1 = arith.constant 0 : i32
    return %c0_i32, %c0_i32_0 : i32, i32
  }
  func.func @transform_4(%arg0: i32) -> (i32, i32) {
    %c0_i32 = arith.constant 0 : i32
    %c0_i32_0 = arith.constant 0 : i32
    %c0_i32_1 = arith.constant 0 : i32
    return %c0_i32, %c0_i32_0 : i32, i32
  }
  func.func @transform_5(%arg0: i32) -> (i32, i32, i32) {
    %c0_i32 = arith.constant 0 : i32
    %c0_i32_0 = arith.constant 0 : i32
    %c0_i32_1 = arith.constant 0 : i32
    %c0_i32_2 = arith.constant 0 : i32
    return %c0_i32, %c0_i32_0, %c0_i32_1 : i32, i32, i32
  }
  func.func @transform_6(%arg0: i32) -> (i32, i32, i32) {
    %c0_i32 = arith.constant 0 : i32
    %c0_i32_0 = arith.constant 0 : i32
    %c0_i32_1 = arith.constant 0 : i32
    %c0_i32_2 = arith.constant 0 : i32
    return %c0_i32, %c0_i32_0, %c0_i32_1 : i32, i32, i32
  }
  func.func @transform_7(%arg0: i32) -> (i32, i32) {
    %c0_i32 = arith.constant 0 : i32
    %c0_i32_0 = arith.constant 0 : i32
    %c0_i32_1 = arith.constant 0 : i32
    return %c0_i32, %c0_i32_0 : i32, i32
  }
  func.func @transform_8(%arg0: i32) -> (i32, i32) {
    %c0_i32 = arith.constant 0 : i32
    %c0_i32_0 = arith.constant 0 : i32
    %c0_i32_1 = arith.constant 0 : i32
    return %c0_i32, %c0_i32_0 : i32, i32
  }
  func.func @transform_9(%arg0: i32) -> (i32, i32) {
    %c0_i32 = arith.constant 0 : i32
    %c0_i32_0 = arith.constant 0 : i32
    return %arg0, %c0_i32 : i32, i32
  }
}

</mosaic_0001>

<bundles_post_ra>
// kernel: tpu_custom_call.1
= control target key start
LH: loop header
LB: loop body
LE: loop exit
PB: predicated region body
PF: predicated region fallthrough
CT: control target
= control target key end

     0   :  { %s1731_s0 = inlined_call_operand.hbm [shape: f32[8,24], index: 0, kind: input, shape index: {}]   ;;  %s1732_s1 = inlined_call_operand.hbm [shape: f32[8,8], index: 1, kind: input, shape index: {}]   ;;  %s1733_s2 = inlined_call_operand.hbm [shape: f32[24,128], index: 2, kind: input, shape index: {}]   ;;  %s1734_s3 = inlined_call_operand.vmem [shape: f32[8,128], index: 3, kind: input, shape index: {}]   ;;  %s1735_s4 = inlined_call_operand.vmem [shape: f32[1,128], index: 4, kind: input, shape index: {}]   ;;  %s1736_s5 = inlined_call_operand.hbm [shape: f32[6,128,128], index: 5, kind: input, shape index: {}]   ;;  %s1737_s6 = inlined_call_operand.vmem [shape: f32[6,1,128], index: 6, kind: input, shape index: {}]   ;;  %s1738_s7 = inlined_call_operand.vmem [shape: f32[1,128], index: 7, kind: input, shape index: {}]   ;;  %s1739_s8 = inlined_call_operand.<no memory space> [shape: f32[1,1], index: 8, kind: input, shape index: {}]   ;;  %s1740_s9 = inlined_call_operand.hbm [shape: f32[1,8], index: 9, kind: output, shape index: {}]  }
   0x1   :  { %v14_v0 = vstv %s1739_s8 }
   0x2   :  { %15 = vst [vmem:[#allocation2] sm:$0x1] %v14_v0 }
   0x3   :  { %16 = vsyncpa [#allocation4], 0 }
   0x4   :  { %17 = vsyncpa [#allocation7], 0 }
   0x5   :  { %18 = vsyncpa [#allocation10], 0 }
   0x6   :  { %19 = vsyncpa [#allocation5], 0  ;;  %s1514_s11 = smov [#allocation6]   ;;  %s1515_s13 = smov [#allocation3]  }
   0x7   :  { %s36_s12 = sshll.u32 %s1514_s11, 4  ;;  %s26_s14 = sshll.u32 %s1515_s13, 4  ;;  %s37_s12 = int_to_ptr.vmem [resolvable:$true] %s36_s12  ;;  %s27_s14 = int_to_ptr.vmem [resolvable:$true] %s26_s14 }
   0x8   :  { %s1396_s17 = scalar_lea.hbm %s1732_s1, 128 }
   0x9   :  { %p1397_p0 = scmp.ne.s32.totalorder %s1732_s1, %s1396_s17  ;;  %p1400_p1 = scmp.lt.u32.totalorder %s1396_s17, %s1732_s1 }
   0xb   :  { %p1402_p2 = pnand %p1400_p1, %p1397_p0 }
   0xd   :  { %1405 = shalt.err (!%p1402_p2)
}
   0xe   :  { %s1406_s21 = scalar_lea.vmem %s37_s12, 128  ;;  %p1411_p4 = scmp.lt.s32.totalorder %s37_s12, %s37_s12 }
   0xf   :  { %p1407_p3 = scmp.ne.s32.totalorder %s37_s12, %s1406_s21  ;;  %p1412_p5 = scmp.lt.s32.totalorder %s1406_s21, %s1406_s21 }
  0x11   :  { %p1413_p6 = por %p1412_p5, %p1411_p4 }
  0x13   :  { %p1414_p7 = pnand %p1413_p6, %p1407_p3 }
  0x15   :  { %1417 = shalt.err (!%p1414_p7)
}
  0x16   :  { %39 = dma.hbm_to_vmem [thread:$0]  %s1732_s1, 128, %s37_s12, [#allocation7]  }
  0x17   :  { %s1418_s26 = scalar_lea.hbm %s1731_s0, 128 }
  0x18   :  { %p1419_p8 = scmp.ne.s32.totalorder %s1731_s0, %s1418_s26  ;;  %p1422_p9 = scmp.lt.u32.totalorder %s1418_s26, %s1731_s0 }
  0x1a   :  { %p1424_p10 = pnand %p1422_p9, %p1419_p8 }
  0x1c   :  { %1427 = shalt.err (!%p1424_p10)
}
  0x1d   :  { %s1428_s10 = scalar_lea.vmem %s27_s14, 128  ;;  %p1433_p12 = scmp.lt.s32.totalorder %s27_s14, %s27_s14 }
  0x1e   :  { %p1429_p11 = scmp.ne.s32.totalorder %s27_s14, %s1428_s10  ;;  %p1434_p13 = scmp.lt.s32.totalorder %s1428_s10, %s1428_s10 }
  0x20   :  { %p1435_p0 = por %p1434_p13, %p1433_p12 }
  0x22   :  { %p1436_p1 = pnand %p1435_p0, %p1429_p11 }
  0x24   :  { %1439 = shalt.err (!%p1436_p1)
}
  0x25   :  { %29 = dma.hbm_to_vmem [thread:$0]  %s1731_s0, 128, %s27_s14, [#allocation4]  }
  0x26   :  { %s1516_s12 = smov [#allocation8]   ;;  %s1440_s17 = scalar_lea.hbm %s1733_s2, 384 }
  0x27   :  { %s45_s13 = sshll.u32 %s1516_s12, 4  ;;  %p1441_p2 = scmp.ne.s32.totalorder %s1733_s2, %s1440_s17  ;;  %s46_s13 = int_to_ptr.vmem [resolvable:$true] %s45_s13 }
  0x28   :  { %p1444_p3 = scmp.lt.u32.totalorder %s1440_s17, %s1733_s2 }
  0x2a   :  { %p1446_p4 = pnand %p1444_p3, %p1441_p2 }
  0x2c   :  { %1449 = shalt.err (!%p1446_p4)
}
  0x2d   :  { %s1450_s21 = scalar_lea.vmem %s46_s13, 384  ;;  %p1455_p6 = scmp.lt.s32.totalorder %s46_s13, %s46_s13 }
  0x2e   :  { %p1451_p5 = scmp.ne.s32.totalorder %s46_s13, %s1450_s21  ;;  %p1456_p7 = scmp.lt.s32.totalorder %s1450_s21, %s1450_s21 }
  0x30   :  { %p1457_p8 = por %p1456_p7, %p1455_p6 }
  0x32   :  { %p1458_p9 = pnand %p1457_p8, %p1451_p5 }
  0x34   :  { %1461 = shalt.err (!%p1458_p9)
}
  0x35   :  { %s1517_s0 = smov 128   ;;  %s1518_s14 = smov 8  }
  0x36   :  { %51 = dma.hbm_to_vmem [thread:$0]  %s1733_s2, 384, %s46_s13, [#allocation7], %s1517_s0, %s1517_s0, %s1518_s14  }
  0x37   :  { %s1519_s24 = smov [#allocation9]   ;;  %s1462_s28 = scalar_lea.hbm %s1736_s5, 12288 }
  0x38   :  { %s61_s25 = sshll.u32 %s1519_s24, 4  ;;  %p1463_p10 = scmp.ne.s32.totalorder %s1736_s5, %s1462_s28  ;;  %s62_s25 = int_to_ptr.vmem [resolvable:$true] %s61_s25 }
  0x39   :  { %p1466_p11 = scmp.lt.u32.totalorder %s1462_s28, %s1736_s5 }
  0x3b   :  { %p1468_p12 = pnand %p1466_p11, %p1463_p10 }
  0x3d   :  { %1471 = shalt.err (!%p1468_p12)
}
  0x3e   :  { %s1472_s11 = scalar_lea.vmem %s62_s25, 12288  ;;  %p1477_p0 = scmp.lt.s32.totalorder %s62_s25, %s62_s25 }
  0x3f   :  { %p1473_p13 = scmp.ne.s32.totalorder %s62_s25, %s1472_s11  ;;  %p1478_p1 = scmp.lt.s32.totalorder %s1472_s11, %s1472_s11 }
  0x41   :  { %p1479_p2 = por %p1478_p1, %p1477_p0 }
  0x43   :  { %p1480_p3 = pnand %p1479_p2, %p1473_p13 }
  0x45   :  { %1483 = shalt.err (!%p1480_p3)
}
  0x46   :  { %67 = dma.hbm_to_vmem [thread:$0]  %s1736_s5, 12288, %s62_s25, [#allocation10], %s1517_s0, %s1517_s0, %s1518_s14  }
  0x47   :  { %1506 = dma.done.wait [#allocation4], 128  }
  0x48   :  { %1507 = vsyncadd [#allocation4], 4294967168 }
  0x49   :  { %1508 = dma.done.wait [#allocation7], 512  }
  0x4a   :  { %1509 = vsyncadd [#allocation7], 4294966784 }
  0x4b   :  { %1510 = dma.done.wait [#allocation10], 12288  }
  0x4c   :  { %1511 = vsyncadd [#allocation10], 4294955008  ;;  %v1520_v1 = vmov 0.0|0.0   ;;  %v1521_v2 = vmov 0.0   ;;  %vm1522_vm0 = vmmov 0   ;;  %vm92_vm1 = vcmask 64512  }
  0x4d   :  { %1239 = vmatprep.subr.bf16.mxu1 %v1520_v1  ;;  %1015 = vmatprep.subr.mxu0 %v1521_v2  ;;  %v87_v3 = vld [vmem:[#allocation8] sm:$0xff]  ;;  %v88_v4 = vld [vmem:[#allocation8 + $0x8] sm:$0xff]  ;;  %v90_v7 = vld [vmem:[#allocation6] sm:$0xff]  ;;  %vm166_vm2 = vcmask 195584   ;;  %s1523_s26 = smov [#allocation11]   ;;  %vm872_vm3 = vcmask 57344  }
  0x4e   :  { %1017 = vmatprep.mubr.msk.f32.mxu0 %vm1522_vm0, %v1521_v2  ;;  %1026 = vmatprep.mubr.msk.f32.mxu1 %vm1522_vm0, %v1521_v2  ;;  %v91_v5 = vld [vmem:[%s1734_s3] sm:$0xff]  ;;  %v1240_v6 = vpack.c.bf16 %v88_v4, %v87_v3  ;;  %v248_v8 = vld [vmem:[#allocation9] sm:$0xff]  ;;  %v249_v9 = vld [vmem:[#allocation9 + $0x8] sm:$0xff]  ;;  %s880_s27 = sshll.u32 %s1523_s26, 4  ;;  %s881_s27 = int_to_ptr.vmem [resolvable:$true] %s880_s27 }
  0x4f   :  { %1016 = vmatpush3.msra.mxu0 %v91_v5  ;;  %v250_v10 = vld [vmem:[#allocation9 + $0x10] sm:$0xff]  ;;  %v1243_v11 = vpack.c.bf16 %v249_v9, %v248_v8  ;;  %v251_v12 = vld [vmem:[#allocation9 + $0x18] sm:$0xff]  ;;  %v252_v16 = vld [vmem:[#allocation9 + $0x20] sm:$0xff]  ;;  %s1488_s28 = scalar_lea.vmem %s881_s27, 32  ;;  %p1489_p5 = scmp.lt.s32.totalorder %s881_s27, %s881_s27 }
  0x50   :  { %1018 = vmatmul.mubr.msk.f32.vlgmr.msra.gmra.mrb[0].mxu0 %vm92_vm1, %v90_v7  ;;  %1242 = vmatprep.subr.bf16.mxu0 %v1520_v1  ;;  %v89_v13 = vld [vmem:[#allocation8 + $0x10] sm:$0xff]  ;;  %v1246_v15 = vpack.c.bf16 %v251_v12, %v250_v10  ;;  %v253_v17 = vld [vmem:[#allocation9 + $0x28] sm:$0xff]  ;;  %v254_v19 = vld [vmem:[#allocation9 + $0x30] sm:$0xff] }
  0x51   :  { %1241 = vmatpush3.bf16.msra.mxu1 %v1240_v6  ;;  %1061 = vmatprep.mubr.msk.f32.mxu0 %vm1522_vm0, %v1521_v2  ;;  %v86_v14 = vld [vmem:[#allocation3] sm:$0xff]  ;;  %v1249_v18 = vpack.c.bf16 %v253_v17, %v252_v16  ;;  %v256_v22 = vld [vmem:[#allocation9 + $0x40] sm:$0xff]  ;;  %v257_v23 = vld [vmem:[#allocation9 + $0x48] sm:$0xff] }
  0x52   :  { %1024 = vmatprep.subr.mxu1 %v1521_v2  ;;  %1244 = vmatpush3.bf16.msra.mxu0 %v1243_v11  ;;  %v255_v20 = vld [vmem:[#allocation9 + $0x38] sm:$0xff]  ;;  %v1255_v24 = vpack.c.bf16 %v257_v23, %v256_v22  ;;  %v258_v25 = vld [vmem:[#allocation9 + $0x50] sm:$0xff]  ;;  %v260_v28 = vld [vmem:[#allocation9 + $0x60] sm:$0xff] }
  0x53   :  { %1245 = vmatprep.subr.bf16.mxu0 %v1520_v1  ;;  %v1252_v21 = vpack.c.bf16 %v255_v20, %v254_v19  ;;  %v259_v26 = vld [vmem:[#allocation9 + $0x58] sm:$0xff]  ;;  %v261_v29 = vld [vmem:[#allocation9 + $0x68] sm:$0xff]  ;;  %v262_v31 = vld [vmem:[#allocation9 + $0x70] sm:$0xff] }
  0x54   :  { %v1258_v27 = vpack.c.bf16 %v259_v26, %v258_v25  ;;  %v1261_v30 = vpack.c.bf16 %v261_v29, %v260_v28  ;;  %v263_v32 = vld [vmem:[#allocation9 + $0x78] sm:$0xff]  ;;  %v343_v34 = vld [vmem:[#allocation9 + $0x80] sm:$0xff]  ;;  %v344_v35 = vld [vmem:[#allocation9 + $0x88] sm:$0xff] }
  0x55   :  { %1025 = vmatpush3.msra.mxu1 %v89_v13  ;;  %v1264_v33 = vpack.c.bf16 %v263_v32, %v262_v31  ;;  %v345_v36 = vld [vmem:[#allocation9 + $0x90] sm:$0xff]  ;;  %v1267_v37 = vpack.c.bf16 %v344_v35, %v343_v34  ;;  %v346_v38 = vld [vmem:[#allocation9 + $0x98] sm:$0xff]  ;;  %v347_v40 = vld [vmem:[#allocation9 + $0xa0] sm:$0xff] }
  0x56   :  { %1027 = vmatmul.mubr.msk.f32.vlgmr.msra.gmra.mrb[0].mxu1 %vm166_vm2, %v86_v14  ;;  %1266 = vmatprep.subr.bf16.mxu1 %v1520_v1  ;;  %v1270_v39 = vpack.c.bf16 %v346_v38, %v345_v36  ;;  %v348_v41 = vld [vmem:[#allocation9 + $0xa8] sm:$0xff]  ;;  %v349_v43 = vld [vmem:[#allocation9 + $0xb0] sm:$0xff]  ;;  %v350_v44 = vld [vmem:[#allocation9 + $0xb8] sm:$0xff] }
  0x57   :  { %1247 = vmatpush3.bf16.msra.mxu0 %v1246_v15  ;;  %1096 = vmatprep.mubr.msk.f32.mxu1 %vm1522_vm0, %v1521_v2  ;;  %v1273_v42 = vpack.c.bf16 %v348_v41, %v347_v40  ;;  %v1276_v45 = vpack.c.bf16 %v350_v44, %v349_v43  ;;  %v351_v46 = vld [vmem:[#allocation9 + $0xc0] sm:$0xff]  ;;  %v352_v47 = vld [vmem:[#allocation9 + $0xc8] sm:$0xff]  ;;  %v353_v49 = vld [vmem:[#allocation9 + $0xd0] sm:$0xff] }
  0x58   :  { %1248 = vmatprep.subr.bf16.mxu0 %v1520_v1  ;;  %1268 = vmatpush3.bf16.msra.mxu1 %v1267_v37  ;;  %v1279_v48 = vpack.c.bf16 %v352_v47, %v351_v46  ;;  %v354_v50 = vld [vmem:[#allocation9 + $0xd8] sm:$0xff]  ;;  %v355_v52 = vld [vmem:[#allocation9 + $0xe0] sm:$0xff]  ;;  %v356_v53 = vld [vmem:[#allocation9 + $0xe8] sm:$0xff] }
  0x59   :  { %1269 = vmatprep.subr.bf16.mxu1 %v1520_v1  ;;  %v1282_v51 = vpack.c.bf16 %v354_v50, %v353_v49  ;;  %v1285_v54 = vpack.c.bf16 %v356_v53, %v355_v52  ;;  %v893_v58 = vld [vmem:[%s1735_s4] ss:$0 sm:$0xff]  ;;  %v358_v63 = vld [vmem:[#allocation9 + $0xf8] sm:$0xff]  ;;  %v439_v3 = vld [vmem:[#allocation9 + $0x100] sm:$0xff] }
  0x5a   :  { %v357_v62 = vld [vmem:[#allocation9 + $0xf0] sm:$0xff]  ;;  %v440_v4 = vld [vmem:[#allocation9 + $0x108] sm:$0xff]  ;;  %v442_v7 = vld [vmem:[#allocation9 + $0x118] sm:$0xff] }
  0x5b   :  { %1250 = vmatpush3.bf16.msra.mxu0 %v1249_v18  ;;  %v1288_v0 = vpack.c.bf16 %v358_v63, %v357_v62  ;;  %v441_v5 = vld [vmem:[#allocation9 + $0x110] sm:$0xff]  ;;  %v1291_v6 = vpack.c.bf16 %v440_v4, %v439_v3  ;;  %v443_v9 = vld [vmem:[#allocation9 + $0x120] sm:$0xff]  ;;  %v444_v10 = vld [vmem:[#allocation9 + $0x128] sm:$0xff] }
  0x5c   :  { %1251 = vmatprep.subr.bf16.mxu0 %v1520_v1  ;;  %1271 = vmatpush3.bf16.msra.mxu1 %v1270_v39  ;;  %v1294_v8 = vpack.c.bf16 %v442_v7, %v441_v5  ;;  %v1297_v11 = vpack.c.bf16 %v444_v10, %v443_v9  ;;  %v445_v12 = vld [vmem:[#allocation9 + $0x130] sm:$0xff]  ;;  %v446_v13 = vld [vmem:[#allocation9 + $0x138] sm:$0xff]  ;;  %v447_v15 = vld [vmem:[#allocation9 + $0x140] sm:$0xff] }
  0x5d   :  { %1272 = vmatprep.subr.bf16.mxu1 %v1520_v1  ;;  %v1300_v14 = vpack.c.bf16 %v446_v13, %v445_v12  ;;  %v448_v16 = vld [vmem:[#allocation9 + $0x148] sm:$0xff]  ;;  %v449_v18 = vld [vmem:[#allocation9 + $0x150] sm:$0xff]  ;;  %v450_v19 = vld [vmem:[#allocation9 + $0x158] sm:$0xff] }
  0x5e   :  { %v1303_v17 = vpack.c.bf16 %v448_v16, %v447_v15  ;;  %v1306_v20 = vpack.c.bf16 %v450_v19, %v449_v18  ;;  %v452_v22 = vld [vmem:[#allocation9 + $0x168] sm:$0xff]  ;;  %v453_v29 = vld [vmem:[#allocation9 + $0x170] sm:$0xff]  ;;  %v535_v32 = vld [vmem:[#allocation9 + $0x180] sm:$0xff] }
  0x5f   :  { %1253 = vmatpush3.bf16.msra.mxu0 %v1252_v21  ;;  %v451_v21 = vld [vmem:[#allocation9 + $0x160] sm:$0xff]  ;;  %v537_v34 = vld [vmem:[#allocation9 + $0x190] sm:$0xff]  ;;  %v538_v36 = vld [vmem:[#allocation9 + $0x198] sm:$0xff] }
  0x60   :  { %1254 = vmatprep.subr.bf16.mxu0 %v1520_v1  ;;  %1274 = vmatpush3.bf16.msra.mxu1 %v1273_v42  ;;  %v1309_v23 = vpack.c.bf16 %v452_v22, %v451_v21  ;;  %v1318_v37 = vpack.c.bf16 %v538_v36, %v537_v34  ;;  %v539_v38 = vld [vmem:[#allocation9 + $0x1a0] sm:$0xff]  ;;  %v540_v39 = vld [vmem:[#allocation9 + $0x1a8] sm:$0xff]  ;;  %v541_v41 = vld [vmem:[#allocation9 + $0x1b0] sm:$0xff] }
  0x61   :  { %1275 = vmatprep.subr.bf16.mxu1 %v1520_v1  ;;  %v1321_v40 = vpack.c.bf16 %v540_v39, %v539_v38  ;;  %v542_v42 = vld [vmem:[#allocation9 + $0x1b8] sm:$0xff]  ;;  %v543_v44 = vld [vmem:[#allocation9 + $0x1c0] sm:$0xff]  ;;  %v545_v47 = vld [vmem:[#allocation9 + $0x1d0] sm:$0xff] }
  0x62   :  { %v1324_v43 = vpack.c.bf16 %v542_v42, %v541_v41  ;;  %v547_v50 = vld [vmem:[#allocation9 + $0x1e0] sm:$0xff]  ;;  %v896_v53 = vld [vmem:[%s1737_s6 + $0x1] ss:$0 sm:$0xff]  ;;  %v632_v62 = vld [vmem:[#allocation9 + $0x208] sm:$0xff] }
  0x63   :  { %1256 = vmatpush3.bf16.msra.mxu0 %v1255_v24  ;;  %v894_v24 = vld [vmem:[%s1737_s6] ss:$0 sm:$0xff]  ;;  %v634_v3 = vld [vmem:[#allocation9 + $0x218] sm:$0xff]  ;;  %v635_v5 = vld [vmem:[#allocation9 + $0x220] sm:$0xff] }
  0x64   :  { %1257 = vmatprep.subr.bf16.mxu0 %v1520_v1  ;;  %1277 = vmatpush3.bf16.msra.mxu1 %v1276_v45  ;;  %v544_v45 = vld [vmem:[#allocation9 + $0x1c8] sm:$0xff]  ;;  %v633_v63 = vld [vmem:[#allocation9 + $0x210] sm:$0xff]  ;;  %v638_v9 = vld [vmem:[#allocation9 + $0x238] sm:$0xff] }
  0x65   :  { %1278 = vmatprep.subr.bf16.mxu1 %v1520_v1  ;;  %v1327_v46 = vpack.c.bf16 %v544_v45, %v543_v44  ;;  %v1342_v4 = vpack.c.bf16 %v634_v3, %v633_v63  ;;  %v640_v12 = vld [vmem:[#allocation9 + $0x248] sm:$0xff]  ;;  %v642_v15 = vld [vmem:[#allocation9 + $0x258] sm:$0xff]  ;;  %v731_v34 = vld [vmem:[#allocation9 + $0x2a0] sm:$0xff] }
  0x66   :  { %v644_v18 = vld [vmem:[#allocation9 + $0x268] sm:$0xff]  ;;  %v735_v39 = vld [vmem:[#allocation9 + $0x2c0] sm:$0xff]  ;;  %v737_v42 = vld [vmem:[#allocation9 + $0x2d0] sm:$0xff] }
  0x67   :  { %1259 = vmatpush3.bf16.msra.mxu0 %v1258_v27  ;;  %v739_v45 = vld [vmem:[#allocation9 + $0x2e0] sm:$0xff] }
  0x68   :  { %1260 = vmatprep.subr.bf16.mxu0 %v1520_v1  ;;  %1280 = vmatpush3.bf16.msra.mxu1 %v1279_v48  ;;  %v546_v48 = vld [vmem:[#allocation9 + $0x1d8] sm:$0xff] }
  0x69   :  { %1281 = vmatprep.subr.bf16.mxu1 %v1520_v1  ;;  %v1330_v49 = vpack.c.bf16 %v546_v48, %v545_v47  ;;  %v900_v48 = vld [vmem:[%s1737_s6 + $0x3] ss:$0 sm:$0xff] }
  0x6b   :  { %1262 = vmatpush3.bf16.msra.mxu0 %v1261_v30  ;;  %v454_v30 = vld [vmem:[#allocation9 + $0x178] sm:$0xff] }
  0x6c   :  { %1263 = vmatprep.subr.bf16.mxu0 %v1520_v1  ;;  %1283 = vmatpush3.bf16.msra.mxu1 %v1282_v51  ;;  %v1312_v31 = vpack.c.bf16 %v454_v30, %v453_v29  ;;  %v548_v51 = vld [vmem:[#allocation9 + $0x1e8] sm:$0xff]  ;;  %v729_v30 = vld [vmem:[#allocation9 + $0x290] sm:$0xff] }
  0x6d   :  { %1284 = vmatprep.subr.bf16.mxu1 %v1520_v1  ;;  %v1333_v52 = vpack.c.bf16 %v548_v51, %v547_v50  ;;  %v728_v29 = vld [vmem:[#allocation9 + $0x288] sm:$0xff] }
  0x6f   :  { %1265 = vmatpush3.bf16.msra.mxu0 %v1264_v33  ;;  %v536_v33 = vld [vmem:[#allocation9 + $0x188] sm:$0xff] }
  0x70   :  { %1290 = vmatprep.subr.bf16.mxu0 %v1520_v1  ;;  %1286 = vmatpush3.bf16.msra.mxu1 %v1285_v54  ;;  %v1315_v35 = vpack.c.bf16 %v536_v33, %v535_v32  ;;  %v730_v32 = vld [vmem:[#allocation9 + $0x298] sm:$0xff] }
  0x71   :  { %1287 = vmatprep.subr.bf16.mxu1 %v1520_v1  ;;  %v1366_v33 = vpack.c.bf16 %v730_v32, %v729_v30 }
  0x74   :  { %1289 = vmatpush3.bf16.msra.mxu1 %v1288_v0 }
  0x75   :  { %1314 = vmatprep.subr.bf16.mxu1 %v1520_v1 }
 0x123   :  { %v162_v55 = vpop.f32.mrb[0].mxu0 }
 0x124   :  { %v1019_v56 = vpop.f32.mrb[1].mxu0 }
 0x129   :  { %v236_v57 = vpop.f32.mrb[0].mxu1 }
 0x12a   :  { %v237_v59 = vadd.f32 %v236_v57, %v162_v55  ;;  %v1028_v60 = vpop.f32.mrb[1].mxu1 }
 0x12c   :  { %v247_v61 = vadd.f32 %v893_v58, %v237_v59  ;;  %v549_v58 = vld [vmem:[#allocation9 + $0x1f0] sm:$0xff]  ;;  %v550_v59 = vld [vmem:[#allocation9 + $0x1f8] sm:$0xff] }
 0x12d   :  { %v1336_v60 = vpack.c.bf16 %v550_v59, %v549_v58 }
 0x12e   :  { %1062 = vmatmul.mubr.f32.vlgmr.msra.gmra.mrb[2].mxu0 %v247_v61  ;;  %v631_v61 = vld [vmem:[#allocation9 + $0x200] sm:$0xff] }
 0x12f   :  { %1131 = vmatprep.mubr.msk.f32.mxu0 %vm1522_vm0, %v1521_v2  ;;  %1292 = vmatpush3.bf16.msra.mxu0 %v1291_v6  ;;  %v1339_v0 = vpack.c.bf16 %v632_v62, %v631_v61  ;;  %v636_v6 = vld [vmem:[#allocation9 + $0x228] sm:$0xff] }
 0x130   :  { %1293 = vmatprep.subr.bf16.mxu0 %v1520_v1  ;;  %v1345_v7 = vpack.c.bf16 %v636_v6, %v635_v5  ;;  %v906_v5 = vld [vmem:[#allocation2] ss:$0 sm:$0xff] }
 0x133   :  { %1295 = vmatpush3.bf16.msra.mxu0 %v1294_v8  ;;  %v637_v8 = vld [vmem:[#allocation9 + $0x230] sm:$0xff] }
 0x134   :  { %1296 = vmatprep.subr.bf16.mxu0 %v1520_v1  ;;  %v1348_v10 = vpack.c.bf16 %v638_v9, %v637_v8 }
 0x137   :  { %1298 = vmatpush3.bf16.msra.mxu0 %v1297_v11  ;;  %v639_v11 = vld [vmem:[#allocation9 + $0x240] sm:$0xff] }
 0x138   :  { %1299 = vmatprep.subr.bf16.mxu0 %v1520_v1  ;;  %v1351_v13 = vpack.c.bf16 %v640_v12, %v639_v11 }
 0x13b   :  { %1301 = vmatpush3.bf16.msra.mxu0 %v1300_v14  ;;  %v641_v14 = vld [vmem:[#allocation9 + $0x250] sm:$0xff] }
 0x13c   :  { %1302 = vmatprep.subr.bf16.mxu0 %v1520_v1  ;;  %v1354_v16 = vpack.c.bf16 %v642_v15, %v641_v14 }
 0x13f   :  { %1304 = vmatpush3.bf16.msra.mxu0 %v1303_v17  ;;  %v643_v17 = vld [vmem:[#allocation9 + $0x260] sm:$0xff] }
 0x140   :  { %1305 = vmatprep.subr.bf16.mxu0 %v1520_v1  ;;  %v1357_v19 = vpack.c.bf16 %v644_v18, %v643_v17 }
 0x143   :  { %1307 = vmatpush3.bf16.msra.mxu0 %v1306_v20  ;;  %v898_v20 = vld [vmem:[%s1737_s6 + $0x2] ss:$0 sm:$0xff] }
 0x144   :  { %1308 = vmatprep.subr.bf16.mxu0 %v1520_v1 }
 0x147   :  { %1310 = vmatpush3.bf16.msra.mxu0 %v1309_v23 }
 0x148   :  { %1311 = vmatprep.subr.bf16.mxu0 %v1520_v1 }
 0x14b   :  { %1313 = vmatpush3.bf16.msra.mxu0 %v1312_v31 }
 0x14c   :  { %1338 = vmatprep.subr.bf16.mxu0 %v1520_v1 }
 0x201   :  { %v337_v25 = vpop.f32.mrb[2].mxu0 }
 0x202   :  { %v338_v26 = vadd.f32 %v894_v24, %v337_v25  ;;  %v1063_v27 = vpop.f32.mrb[3].mxu0  ;;  %v645_v25 = vld [vmem:[#allocation9 + $0x270] sm:$0xff] }
 0x204   :  { %v341_v28 = vmax.f32 %v338_v26, 0.0  ;;  %v646_v26 = vld [vmem:[#allocation9 + $0x278] sm:$0xff] }
 0x205   :  { %v1360_v27 = vpack.c.bf16 %v646_v26, %v645_v25 }
 0x206   :  { %1097 = vmatmul.mubr.f32.vlgmr.msra.gmra.mrb[2].mxu1 %v341_v28  ;;  %v727_v28 = vld [vmem:[#allocation9 + $0x280] sm:$0xff] }
 0x207   :  { %1166 = vmatprep.mubr.msk.f32.mxu1 %vm1522_vm0, %v1521_v2  ;;  %1316 = vmatpush3.bf16.msra.mxu1 %v1315_v35  ;;  %v1363_v31 = vpack.c.bf16 %v728_v29, %v727_v28  ;;  %v732_v35 = vld [vmem:[#allocation9 + $0x2a8] sm:$0xff] }
 0x208   :  { %1317 = vmatprep.subr.bf16.mxu1 %v1520_v1  ;;  %v1369_v36 = vpack.c.bf16 %v732_v35, %v731_v34 }
 0x20b   :  { %1319 = vmatpush3.bf16.msra.mxu1 %v1318_v37  ;;  %v734_v37 = vld [vmem:[#allocation9 + $0x2b8] sm:$0xff] }
 0x20c   :  { %1320 = vmatprep.subr.bf16.mxu1 %v1520_v1 }
 0x20f   :  { %1322 = vmatpush3.bf16.msra.mxu1 %v1321_v40  ;;  %v736_v40 = vld [vmem:[#allocation9 + $0x2c8] sm:$0xff] }
 0x210   :  { %1323 = vmatprep.subr.bf16.mxu1 %v1520_v1  ;;  %v1375_v41 = vpack.c.bf16 %v736_v40, %v735_v39 }
 0x213   :  { %1325 = vmatpush3.bf16.msra.mxu1 %v1324_v43  ;;  %v738_v43 = vld [vmem:[#allocation9 + $0x2d8] sm:$0xff] }
 0x214   :  { %1326 = vmatprep.subr.bf16.mxu1 %v1520_v1  ;;  %v1378_v44 = vpack.c.bf16 %v738_v43, %v737_v42 }
 0x217   :  { %1328 = vmatpush3.bf16.msra.mxu1 %v1327_v46  ;;  %v740_v46 = vld [vmem:[#allocation9 + $0x2e8] sm:$0xff] }
 0x218   :  { %1329 = vmatprep.subr.bf16.mxu1 %v1520_v1  ;;  %v1381_v47 = vpack.c.bf16 %v740_v46, %v739_v45 }
 0x21b   :  { %1331 = vmatpush3.bf16.msra.mxu1 %v1330_v49 }
 0x21c   :  { %1332 = vmatprep.subr.bf16.mxu1 %v1520_v1 }
 0x21f   :  { %1334 = vmatpush3.bf16.msra.mxu1 %v1333_v52 }
 0x220   :  { %1335 = vmatprep.subr.bf16.mxu1 %v1520_v1 }
 0x223   :  { %1337 = vmatpush3.bf16.msra.mxu1 %v1336_v60  ;;  %v904_v60 = vld [vmem:[%s1737_s6 + $0x5] ss:$0 sm:$0xff] }
 0x224   :  { %1362 = vmatprep.subr.bf16.mxu1 %v1520_v1 }
 0x2d9   :  { %v433_v54 = vpop.f32.mrb[2].mxu1 }
 0x2da   :  { %v434_v55 = vadd.f32 %v896_v53, %v433_v54  ;;  %v1098_v56 = vpop.f32.mrb[3].mxu1  ;;  %v741_v53 = vld [vmem:[#allocation9 + $0x2f0] sm:$0xff]  ;;  %v742_v54 = vld [vmem:[#allocation9 + $0x2f8] sm:$0xff] }
 0x2db   :  { %v902_v56 = vld [vmem:[%s1737_s6 + $0x4] ss:$0 sm:$0xff]  ;;  %s1484_s6 = scalar_lea.vmem %s881_s27, 16 }
 0x2dc   :  { %v437_v57 = vmax.f32 %v434_v55, 0.0  ;;  %v1384_v55 = vpack.c.bf16 %v742_v54, %v741_v53  ;;  %p1485_p4 = scmp.ne.s32.totalorder %s881_s27, %s1484_s6  ;;  %p1490_p6 = scmp.lt.s32.totalorder %s1488_s28, %s1484_s6 }
 0x2de   :  { %1132 = vmatmul.mubr.f32.vlgmr.msra.gmra.mrb[4].mxu0 %v437_v57  ;;  %p1491_p7 = por %p1490_p6, %p1489_p5 }
 0x2df   :  { %1201 = vmatprep.mubr.msk.f32.mxu0 %vm1522_vm0, %v1521_v2  ;;  %1340 = vmatpush3.bf16.msra.mxu0 %v1339_v0  ;;  %v905_v0 = vld [vmem:[%s1738_s7] ss:$0 sm:$0xff] }
 0x2e0   :  { %1341 = vmatprep.subr.bf16.mxu0 %v1520_v1  ;;  %p1492_p8 = pnand %p1491_p7, %p1485_p4 }
 0x2e3   :  { %1343 = vmatpush3.bf16.msra.mxu0 %v1342_v4 }
 0x2e4   :  { %1344 = vmatprep.subr.bf16.mxu0 %v1520_v1 }
 0x2e7   :  { %1346 = vmatpush3.bf16.msra.mxu0 %v1345_v7 }
 0x2e8   :  { %1347 = vmatprep.subr.bf16.mxu0 %v1520_v1 }
 0x2eb   :  { %1349 = vmatpush3.bf16.msra.mxu0 %v1348_v10 }
 0x2ec   :  { %1350 = vmatprep.subr.bf16.mxu0 %v1520_v1 }
 0x2ef   :  { %1352 = vmatpush3.bf16.msra.mxu0 %v1351_v13 }
 0x2f0   :  { %1353 = vmatprep.subr.bf16.mxu0 %v1520_v1 }
 0x2f3   :  { %1355 = vmatpush3.bf16.msra.mxu0 %v1354_v16 }
 0x2f4   :  { %1356 = vmatprep.subr.bf16.mxu0 %v1520_v1 }
 0x2f7   :  { %1358 = vmatpush3.bf16.msra.mxu0 %v1357_v19 }
 0x2f8   :  { %1359 = vmatprep.subr.bf16.mxu0 %v1520_v1 }
 0x2fb   :  { %1361 = vmatpush3.bf16.msra.mxu0 %v1360_v27 }
 0x3b1   :  { %v529_v21 = vpop.f32.mrb[4].mxu0 }
 0x3b2   :  { %v530_v22 = vadd.f32 %v898_v20, %v529_v21  ;;  %v1133_v23 = vpop.f32.mrb[5].mxu0 }
 0x3b4   :  { %v533_v24 = vmax.f32 %v530_v22, 0.0 }
 0x3b6   :  { %1167 = vmatmul.mubr.f32.vlgmr.msra.gmra.mrb[4].mxu1 %v533_v24 }
 0x3b7   :  { %1236 = vmatprep.mubr.msk.f32.mxu1 %vm1522_vm0, %v1521_v2  ;;  %1364 = vmatpush3.bf16.msra.mxu1 %v1363_v31  ;;  %v733_v2 = vld [vmem:[#allocation9 + $0x2b0] sm:$0xff] }
 0x3b8   :  { %1365 = vmatprep.subr.bf16.mxu1 %v1520_v1  ;;  %v1372_v38 = vpack.c.bf16 %v734_v37, %v733_v2 }
 0x3bb   :  { %1367 = vmatpush3.bf16.msra.mxu1 %v1366_v33 }
 0x3bc   :  { %1368 = vmatprep.subr.bf16.mxu1 %v1520_v1 }
 0x3bf   :  { %1370 = vmatpush3.bf16.msra.mxu1 %v1369_v36 }
 0x3c0   :  { %1371 = vmatprep.subr.bf16.mxu1 %v1520_v1 }
 0x3c3   :  { %1373 = vmatpush3.bf16.msra.mxu1 %v1372_v38 }
 0x3c4   :  { %1374 = vmatprep.subr.bf16.mxu1 %v1520_v1 }
 0x3c7   :  { %1376 = vmatpush3.bf16.msra.mxu1 %v1375_v41 }
 0x3c8   :  { %1377 = vmatprep.subr.bf16.mxu1 %v1520_v1 }
 0x3cb   :  { %1379 = vmatpush3.bf16.msra.mxu1 %v1378_v44 }
 0x3cc   :  { %1380 = vmatprep.subr.bf16.mxu1 %v1520_v1 }
 0x3cf   :  { %1382 = vmatpush3.bf16.msra.mxu1 %v1381_v47 }
 0x3d0   :  { %1383 = vmatprep.subr.bf16.mxu1 %v1520_v1 }
 0x3d3   :  { %1385 = vmatpush3.bf16.msra.mxu1 %v1384_v55 }
 0x489   :  { %v625_v49 = vpop.f32.mrb[4].mxu1 }
 0x48a   :  { %v626_v50 = vadd.f32 %v900_v48, %v625_v49  ;;  %v1168_v51 = vpop.f32.mrb[5].mxu1 }
 0x48c   :  { %v629_v52 = vmax.f32 %v626_v50, 0.0 }
 0x48e   :  { %1202 = vmatmul.mubr.f32.vlgmr.msra.gmra.mrb[6].mxu0 %v629_v52 }
 0x561   :  { %v721_v57 = vpop.f32.mrb[6].mxu0 }
 0x562   :  { %v722_v58 = vadd.f32 %v902_v56, %v721_v57  ;;  %v1203_v1 = vpop.f32.mrb[7].mxu0 }
 0x564   :  { %v725_v59 = vmax.f32 %v722_v58, 0.0 }
 0x566   :  { %1237 = vmatmul.mubr.f32.vlgmr.msra.gmra.mrb[6].mxu1 %v725_v59 }
 0x639   :  { %v817_v61 = vpop.f32.mrb[6].mxu1 }
 0x63a   :  { %v818_v62 = vadd.f32 %v904_v60, %v817_v61  ;;  %v1238_v63 = vpop.f32.mrb[7].mxu1 }
 0x63c   :  { %v821_v3 = vmax.f32 %v818_v62, 0.0 }
 0x63e   :  { %v829_v4 = vmul.f32 %v905_v0, %v821_v3 }
 0x640   :  { %830 = vadd.xlane.f32.xlu0 %v829_v4 }
 0x6cd   :  { %v831_v6 = vpop.xlane.xlu0 %830 }
 0x6ce   :  { %v839_v7 = vadd.f32 %v906_v5, %v831_v6 }
 0x6d0   :  { %840 = vxpose.xlu0.b32.start.end [1/1] (short) (narrow) %v839_v7, 8 }
 0x750   :  { %v856_v8 = vpop.trf.xlu0 }
 0x751   :  { %873 = vst.msk [vmem:[#allocation11] sm:$0x1] %vm872_vm3, %v856_v8 }
 0x752   :  { %1495 = shalt.err (!%p1492_p8)
}
 0x753   :  { %s1496_s30 = scalar_lea.hbm %s1740_s9, 16 }
 0x754   :  { %p1497_p9 = scmp.ne.s32.totalorder %s1740_s9, %s1496_s30  ;;  %p1500_p10 = scmp.lt.u32.totalorder %s1496_s30, %s1740_s9 }
 0x756   :  { %p1502_p11 = pnand %p1500_p10, %p1497_p9 }
 0x758   :  { %1505 = shalt.err (!%p1502_p11)
}
 0x759   :  { %883 = dma.vmem_to_hbm [thread:$0]  %s881_s27, 16, %s1740_s9, [#allocation5]  }
 0x75a   :  { %1512 = dma.done.wait [#allocation5], 16  }
 0x75b   :  { %1513 = vsyncadd [#allocation5], 4294967280 }
 0x75c   :  { %887 = vsyncpa [#allocation4], 1 }
 0x75d   :  { %888 = vsyncpa [#allocation7], 1 }
 0x75e   :  { %889 = vsyncpa [#allocation10], 1 }
 0x75f   :  { %890 = vsyncpa [#allocation5], 1 }

// kernel: tpu_custom_call.1
= control target key start
LH: loop header
LB: loop body
LE: loop exit
PB: predicated region body
PF: predicated region fallthrough
CT: control target
= control target key end

     0   :  { %s1731_s0 = inlined_call_operand.hbm [shape: f32[8,24], index: 0, kind: input, shape index: {}]   ;;  %s1732_s1 = inlined_call_operand.hbm [shape: f32[8,8], index: 1, kind: input, shape index: {}]   ;;  %s1733_s2 = inlined_call_operand.hbm [shape: f32[24,128], index: 2, kind: input, shape index: {}]   ;;  %s1734_s3 = inlined_call_operand.vmem [shape: f32[8,128], index: 3, kind: input, shape index: {}]   ;;  %s1735_s4 = inlined_call_operand.vmem [shape: f32[1,128], index: 4, kind: input, shape index: {}]   ;;  %s1736_s5 = inlined_call_operand.hbm [shape: f32[6,128,128], index: 5, kind: input, shape index: {}]   ;;  %s1737_s6 = inlined_call_operand.vmem [shape: f32[6,1,128], index: 6, kind: input, shape index: {}]   ;;  %s1738_s7 = inlined_call_operand.vmem [shape: f32[1,128], index: 7, kind: input, shape index: {}]   ;;  %s1739_s8 = inlined_call_operand.<no memory space> [shape: f32[1,1], index: 8, kind: input, shape index: {}]   ;;  %s1740_s9 = inlined_call_operand.hbm [shape: f32[1,8], index: 9, kind: output, shape index: {}]  }
   0x1   :  { %v14_v0 = vstv %s1739_s8 }
   0x2   :  { %15 = vst [vmem:[#allocation2] sm:$0x1] %v14_v0 }
   0x3   :  { %16 = vsyncpa [#allocation4], 0 }
   0x4   :  { %17 = vsyncpa [#allocation7], 0 }
   0x5   :  { %18 = vsyncpa [#allocation10], 0 }
   0x6   :  { %19 = vsyncpa [#allocation5], 0  ;;  %s1514_s11 = smov [#allocation6]   ;;  %s1515_s13 = smov [#allocation3]  }
   0x7   :  { %s36_s12 = sshll.u32 %s1514_s11, 4  ;;  %s26_s14 = sshll.u32 %s1515_s13, 4  ;;  %s37_s12 = int_to_ptr.vmem [resolvable:$true] %s36_s12  ;;  %s27_s14 = int_to_ptr.vmem [resolvable:$true] %s26_s14 }
   0x8   :  { %s1396_s17 = scalar_lea.hbm %s1732_s1, 128 }
   0x9   :  { %p1397_p0 = scmp.ne.s32.totalorder %s1732_s1, %s1396_s17  ;;  %p1400_p1 = scmp.lt.u32.totalorder %s1396_s17, %s1732_s1 }
   0xb   :  { %p1402_p2 = pnand %p1400_p1, %p1397_p0 }
   0xd   :  { %1405 = shalt.err (!%p1402_p2)
}
   0xe   :  { %s1406_s21 = scalar_lea.vmem %s37_s12, 128  ;;  %p1411_p4 = scmp.lt.s32.totalorder %s37_s12, %s37_s12 }
   0xf   :  { %p1407_p3 = scmp.ne.s32.totalorder %s37_s12, %s1406_s21  ;;  %p1412_p5 = scmp.lt.s32.totalorder %s1406_s21, %s1406_s21 }
  0x11   :  { %p1413_p6 = por %p1412_p5, %p1411_p4 }
  0x13   :  { %p1414_p7 = pnand %p1413_p6, %p1407_p3 }
  0x15   :  { %1417 = shalt.err (!%p1414_p7)
}
  0x16   :  { %39 = dma.hbm_to_vmem [thread:$0]  %s1732_s1, 128, %s37_s12, [#allocation7]  }
  0x17   :  { %s1418_s26 = scalar_lea.hbm %s1731_s0, 128 }
  0x18   :  { %p1419_p8 = scmp.ne.s32.totalorder %s1731_s0, %s1418_s26  ;;  %p1422_p9 = scmp.lt.u32.totalorder %s1418_s26, %s1731_s0 }
  0x1a   :  { %p1424_p10 = pnand %p1422_p9, %p1419_p8 }
  0x1c   :  { %1427 = shalt.err (!%p1424_p10)
}
  0x1d   :  { %s1428_s10 = scalar_lea.vmem %s27_s14, 128  ;;  %p1433_p12 = scmp.lt.s32.totalorder %s27_s14, %s27_s14 }
  0x1e   :  { %p1429_p11 = scmp.ne.s32.totalorder %s27_s14, %s1428_s10  ;;  %p1434_p13 = scmp.lt.s32.totalorder %s1428_s10, %s1428_s10 }
  0x20   :  { %p1435_p0 = por %p1434_p13, %p1433_p12 }
  0x22   :  { %p1436_p1 = pnand %p1435_p0, %p1429_p11 }
  0x24   :  { %1439 = shalt.err (!%p1436_p1)
}
  0x25   :  { %29 = dma.hbm_to_vmem [thread:$0]  %s1731_s0, 128, %s27_s14, [#allocation4]  }
  0x26   :  { %s1516_s12 = smov [#allocation8]   ;;  %s1440_s17 = scalar_lea.hbm %s1733_s2, 384 }
  0x27   :  { %s45_s13 = sshll.u32 %s1516_s12, 4  ;;  %p1441_p2 = scmp.ne.s32.totalorder %s1733_s2, %s1440_s17  ;;  %s46_s13 = int_to_ptr.vmem [resolvable:$true] %s45_s13 }
  0x28   :  { %p1444_p3 = scmp.lt.u32.totalorder %s1440_s17, %s1733_s2 }
  0x2a   :  { %p1446_p4 = pnand %p1444_p3, %p1441_p2 }
  0x2c   :  { %1449 = shalt.err (!%p1446_p4)
}
  0x2d   :  { %s1450_s21 = scalar_lea.vmem %s46_s13, 384  ;;  %p1455_p6 = scmp.lt.s32.totalorder %s46_s13, %s46_s13 }
  0x2e   :  { %p1451_p5 = scmp.ne.s32.totalorder %s46_s13, %s1450_s21  ;;  %p1456_p7 = scmp.lt.s32.totalorder %s1450_s21, %s1450_s21 }
  0x30   :  { %p1457_p8 = por %p1456_p7, %p1455_p6 }
  0x32   :  { %p1458_p9 = pnand %p1457_p8, %p1451_p5 }
  0x34   :  { %1461 = shalt.err (!%p1458_p9)
}
  0x35   :  { %s1517_s0 = smov 128   ;;  %s1518_s14 = smov 8  }
  0x36   :  { %51 = dma.hbm_to_vmem [thread:$0]  %s1733_s2, 384, %s46_s13, [#allocation7], %s1517_s0, %s1517_s0, %s1518_s14  }
  0x37   :  { %s1519_s24 = smov [#allocation9]   ;;  %s1462_s28 = scalar_lea.hbm %s1736_s5, 12288 }
  0x38   :  { %s61_s25 = sshll.u32 %s1519_s24, 4  ;;  %p1463_p10 = scmp.ne.s32.totalorder %s1736_s5, %s1462_s28  ;;  %s62_s25 = int_to_ptr.vmem [resolvable:$true] %s61_s25 }
  0x39   :  { %p1466_p11 = scmp.lt.u32.totalorder %s1462_s28, %s1736_s5 }
  0x3b   :  { %p1468_p12 = pnand %p1466_p11, %p1463_p10 }
  0x3d   :  { %1471 = shalt.err (!%p1468_p12)
}
  0x3e   :  { %s1472_s11 = scalar_lea.vmem %s62_s25, 12288  ;;  %p1477_p0 = scmp.lt.s32.totalorder %s62_s25, %s62_s25 }
  0x3f   :  { %p1473_p13 = scmp.ne.s32.totalorder %s62_s25, %s1472_s11  ;;  %p1478_p1 = scmp.lt.s32.totalorder %s1472_s11, %s1472_s11 }
  0x41   :  { %p1479_p2 = por %p1478_p1, %p1477_p0 }
  0x43   :  { %p1480_p3 = pnand %p1479_p2, %p1473_p13 }
  0x45   :  { %1483 = shalt.err (!%p1480_p3)
}
  0x46   :  { %67 = dma.hbm_to_vmem [thread:$0]  %s1736_s5, 12288, %s62_s25, [#allocation10], %s1517_s0, %s1517_s0, %s1518_s14  }
  0x47   :  { %1506 = dma.done.wait [#allocation4], 128  }
  0x48   :  { %1507 = vsyncadd [#allocation4], 4294967168 }
  0x49   :  { %1508 = dma.done.wait [#allocation7], 512  }
  0x4a   :  { %1509 = vsyncadd [#allocation7], 4294966784 }
  0x4b   :  { %1510 = dma.done.wait [#allocation10], 12288  }
  0x4c   :  { %1511 = vsyncadd [#allocation10], 4294955008  ;;  %v1520_v1 = vmov 0.0|0.0   ;;  %v1521_v2 = vmov 0.0   ;;  %vm1522_vm0 = vmmov 0   ;;  %vm92_vm1 = vcmask 64512  }
  0x4d   :  { %1239 = vmatprep.subr.bf16.mxu1 %v1520_v1  ;;  %1015 = vmatprep.subr.mxu0 %v1521_v2  ;;  %v87_v3 = vld [vmem:[#allocation8] sm:$0xff]  ;;  %v88_v4 = vld [vmem:[#allocation8 + $0x8] sm:$0xff]  ;;  %v90_v7 = vld [vmem:[#allocation6] sm:$0xff]  ;;  %vm166_vm2 = vcmask 195584   ;;  %s1523_s26 = smov [#allocation11]   ;;  %vm872_vm3 = vcmask 57344  }
  0x4e   :  { %1017 = vmatprep.mubr.msk.f32.mxu0 %vm1522_vm0, %v1521_v2  ;;  %1026 = vmatprep.mubr.msk.f32.mxu1 %vm1522_vm0, %v1521_v2  ;;  %v91_v5 = vld [vmem:[%s1734_s3] sm:$0xff]  ;;  %v1240_v6 = vpack.c.bf16 %v88_v4, %v87_v3  ;;  %v248_v8 = vld [vmem:[#allocation9] sm:$0xff]  ;;  %v249_v9 = vld [vmem:[#allocation9 + $0x8] sm:$0xff]  ;;  %s880_s27 = sshll.u32 %s1523_s26, 4  ;;  %s881_s27 = int_to_ptr.vmem [resolvable:$true] %s880_s27 }
  0x4f   :  { %1016 = vmatpush3.msra.mxu0 %v91_v5  ;;  %v250_v10 = vld [vmem:[#allocation9 + $0x10] sm:$0xff]  ;;  %v1243_v11 = vpack.c.bf16 %v249_v9, %v248_v8  ;;  %v251_v12 = vld [vmem:[#allocation9 + $0x18] sm:$0xff]  ;;  %v252_v16 = vld [vmem:[#allocation9 + $0x20] sm:$0xff]  ;;  %s1488_s28 = scalar_lea.vmem %s881_s27, 32  ;;  %p1489_p5 = scmp.lt.s32.totalorder %s881_s27, %s881_s27 }
  0x50   :  { %1018 = vmatmul.mubr.msk.f32.vlgmr.msra.gmra.mrb[0].mxu0 %vm92_vm1, %v90_v7  ;;  %1242 = vmatprep.subr.bf16.mxu0 %v1520_v1  ;;  %v89_v13 = vld [vmem:[#allocation8 + $0x10] sm:$0xff]  ;;  %v1246_v15 = vpack.c.bf16 %v251_v12, %v250_v10  ;;  %v253_v17 = vld [vmem:[#allocation9 + $0x28] sm:$0xff]  ;;  %v254_v19 = vld [vmem:[#allocation9 + $0x30] sm:$0xff] }
  0x51   :  { %1241 = vmatpush3.bf16.msra.mxu1 %v1240_v6  ;;  %1061 = vmatprep.mubr.msk.f32.mxu0 %vm1522_vm0, %v1521_v2  ;;  %v86_v14 = vld [vmem:[#allocation3] sm:$0xff]  ;;  %v1249_v18 = vpack.c.bf16 %v253_v17, %v252_v16  ;;  %v256_v22 = vld [vmem:[#allocation9 + $0x40] sm:$0xff]  ;;  %v257_v23 = vld [vmem:[#allocation9 + $0x48] sm:$0xff] }
  0x52   :  { %1024 = vmatprep.subr.mxu1 %v1521_v2  ;;  %1244 = vmatpush3.bf16.msra.mxu0 %v1243_v11  ;;  %v255_v20 = vld [vmem:[#allocation9 + $0x38] sm:$0xff]  ;;  %v1255_v24 = vpack.c.bf16 %v257_v23, %v256_v22  ;;  %v258_v25 = vld [vmem:[#allocation9 + $0x50] sm:$0xff]  ;;  %v260_v28 = vld [vmem:[#allocation9 + $0x60] sm:$0xff] }
  0x53   :  { %1245 = vmatprep.subr.bf16.mxu0 %v1520_v1  ;;  %v1252_v21 = vpack.c.bf16 %v255_v20, %v254_v19  ;;  %v259_v26 = vld [vmem:[#allocation9 + $0x58] sm:$0xff]  ;;  %v261_v29 = vld [vmem:[#allocation9 + $0x68] sm:$0xff]  ;;  %v262_v31 = vld [vmem:[#allocation9 + $0x70] sm:$0xff] }
  0x54   :  { %v1258_v27 = vpack.c.bf16 %v259_v26, %v258_v25  ;;  %v1261_v30 = vpack.c.bf16 %v261_v29, %v260_v28  ;;  %v263_v32 = vld [vmem:[#allocation9 + $0x78] sm:$0xff]  ;;  %v343_v34 = vld [vmem:[#allocation9 + $0x80] sm:$0xff]  ;;  %v344_v35 = vld [vmem:[#allocation9 + $0x88] sm:$0xff] }
  0x55   :  { %1025 = vmatpush3.msra.mxu1 %v89_v13  ;;  %v1264_v33 = vpack.c.bf16 %v263_v32, %v262_v31  ;;  %v345_v36 = vld [vmem:[#allocation9 + $0x90] sm:$0xff]  ;;  %v1267_v37 = vpack.c.bf16 %v344_v35, %v343_v34  ;;  %v346_v38 = vld [vmem:[#allocation9 + $0x98] sm:$0xff]  ;;  %v347_v40 = vld [vmem:[#allocation9 + $0xa0] sm:$0xff] }
  0x56   :  { %1027 = vmatmul.mubr.msk.f32.vlgmr.msra.gmra.mrb[0].mxu1 %vm166_vm2, %v86_v14  ;;  %1266 = vmatprep.subr.bf16.mxu1 %v1520_v1  ;;  %v1270_v39 = vpack.c.bf16 %v346_v38, %v345_v36  ;;  %v348_v41 = vld [vmem:[#allocation9 + $0xa8] sm:$0xff]  ;;  %v349_v43 = vld [vmem:[#allocation9 + $0xb0] sm:$0xff]  ;;  %v350_v44 = vld [vmem:[#allocation9 + $0xb8] sm:$0xff] }
  0x57   :  { %1247 = vmatpush3.bf16.msra.mxu0 %v1246_v15  ;;  %1096 = vmatprep.mubr.msk.f32.mxu1 %vm1522_vm0, %v1521_v2  ;;  %v1273_v42 = vpack.c.bf16 %v348_v41, %v347_v40  ;;  %v1276_v45 = vpack.c.bf16 %v350_v44, %v349_v43  ;;  %v351_v46 = vld [vmem:[#allocation9 + $0xc0] sm:$0xff]  ;;  %v352_v47 = vld [vmem:[#allocation9 + $0xc8] sm:$0xff]  ;;  %v353_v49 = vld [vmem:[#allocation9 + $0xd0] sm:$0xff] }
  0x58   :  { %1248 = vmatprep.subr.bf16.mxu0 %v1520_v1  ;;  %1268 = vmatpush3.bf16.msra.mxu1 %v1267_v37  ;;  %v1279_v48 = vpack.c.bf16 %v352_v47, %v351_v46  ;;  %v354_v50 = vld [vmem:[#allocation9 + $0xd8] sm:$0xff]  ;;  %v355_v52 = vld [vmem:[#allocation9 + $0xe0] sm:$0xff]  ;;  %v356_v53 = vld [vmem:[#allocation9 + $0xe8] sm:$0xff] }
  0x59   :  { %1269 = vmatprep.subr.bf16.mxu1 %v1520_v1  ;;  %v1282_v51 = vpack.c.bf16 %v354_v50, %v353_v49  ;;  %v1285_v54 = vpack.c.bf16 %v356_v53, %v355_v52  ;;  %v893_v58 = vld [vmem:[%s1735_s4] ss:$0 sm:$0xff]  ;;  %v358_v63 = vld [vmem:[#allocation9 + $0xf8] sm:$0xff]  ;;  %v439_v3 = vld [vmem:[#allocation9 + $0x100] sm:$0xff] }
  0x5a   :  { %v357_v62 = vld [vmem:[#allocation9 + $0xf0] sm:$0xff]  ;;  %v440_v4 = vld [vmem:[#allocation9 + $0x108] sm:$0xff]  ;;  %v442_v7 = vld [vmem:[#allocation9 + $0x118] sm:$0xff] }
  0x5b   :  { %1250 = vmatpush3.bf16.msra.mxu0 %v1249_v18  ;;  %v1288_v0 = vpack.c.bf16 %v358_v63, %v357_v62  ;;  %v441_v5 = vld [vmem:[#allocation9 + $0x110] sm:$0xff]  ;;  %v1291_v6 = vpack.c.bf16 %v440_v4, %v439_v3  ;;  %v443_v9 = vld [vmem:[#allocation9 + $0x120] sm:$0xff]  ;;  %v444_v10 = vld [vmem:[#allocation9 + $0x128] sm:$0xff] }
  0x5c   :  { %1251 = vmatprep.subr.bf16.mxu0 %v1520_v1  ;;  %1271 = vmatpush3.bf16.msra.mxu1 %v1270_v39  ;;  %v1294_v8 = vpack.c.bf16 %v442_v7, %v441_v5  ;;  %v1297_v11 = vpack.c.bf16 %v444_v10, %v443_v9  ;;  %v445_v12 = vld [vmem:[#allocation9 + $0x130] sm:$0xff]  ;;  %v446_v13 = vld [vmem:[#allocation9 + $0x138] sm:$0xff]  ;;  %v447_v15 = vld [vmem:[#allocation9 + $0x140] sm:$0xff] }
  0x5d   :  { %1272 = vmatprep.subr.bf16.mxu1 %v1520_v1  ;;  %v1300_v14 = vpack.c.bf16 %v446_v13, %v445_v12  ;;  %v448_v16 = vld [vmem:[#allocation9 + $0x148] sm:$0xff]  ;;  %v449_v18 = vld [vmem:[#allocation9 + $0x150] sm:$0xff]  ;;  %v450_v19 = vld [vmem:[#allocation9 + $0x158] sm:$0xff] }
  0x5e   :  { %v1303_v17 = vpack.c.bf16 %v448_v16, %v447_v15  ;;  %v1306_v20 = vpack.c.bf16 %v450_v19, %v449_v18  ;;  %v452_v22 = vld [vmem:[#allocation9 + $0x168] sm:$0xff]  ;;  %v453_v29 = vld [vmem:[#allocation9 + $0x170] sm:$0xff]  ;;  %v535_v32 = vld [vmem:[#allocation9 + $0x180] sm:$0xff] }
  0x5f   :  { %1253 = vmatpush3.bf16.msra.mxu0 %v1252_v21  ;;  %v451_v21 = vld [vmem:[#allocation9 + $0x160] sm:$0xff]  ;;  %v537_v34 = vld [vmem:[#allocation9 + $0x190] sm:$0xff]  ;;  %v538_v36 = vld [vmem:[#allocation9 + $0x198] sm:$0xff] }
  0x60   :  { %1254 = vmatprep.subr.bf16.mxu0 %v1520_v1  ;;  %1274 = vmatpush3.bf16.msra.mxu1 %v1273_v42  ;;  %v1309_v23 = vpack.c.bf16 %v452_v22, %v451_v21  ;;  %v1318_v37 = vpack.c.bf16 %v538_v36, %v537_v34  ;;  %v539_v38 = vld [vmem:[#allocation9 + $0x1a0] sm:$0xff]  ;;  %v540_v39 = vld [vmem:[#allocation9 + $0x1a8] sm:$0xff]  ;;  %v541_v41 = vld [vmem:[#allocation9 + $0x1b0] sm:$0xff] }
  0x61   :  { %1275 = vmatprep.subr.bf16.mxu1 %v1520_v1  ;;  %v1321_v40 = vpack.c.bf16 %v540_v39, %v539_v38  ;;  %v542_v42 = vld [vmem:[#allocation9 + $0x1b8] sm:$0xff]  ;;  %v543_v44 = vld [vmem:[#allocation9 + $0x1c0] sm:$0xff]  ;;  %v545_v47 = vld [vmem:[#allocation9 + $0x1d0] sm:$0xff] }
  0x62   :  { %v1324_v43 = vpack.c.bf16 %v542_v42, %v541_v41  ;;  %v547_v50 = vld [vmem:[#allocation9 + $0x1e0] sm:$0xff]  ;;  %v896_v53 = vld [vmem:[%s1737_s6 + $0x1] ss:$0 sm:$0xff]  ;;  %v632_v62 = vld [vmem:[#allocation9 + $0x208] sm:$0xff] }
  0x63   :  { %1256 = vmatpush3.bf16.msra.mxu0 %v1255_v24  ;;  %v894_v24 = vld [vmem:[%s1737_s6] ss:$0 sm:$0xff]  ;;  %v634_v3 = vld [vmem:[#allocation9 + $0x218] sm:$0xff]  ;;  %v635_v5 = vld [vmem:[#allocation9 + $0x220] sm:$0xff] }
  0x64   :  { %1257 = vmatprep.subr.bf16.mxu0 %v1520_v1  ;;  %1277 = vmatpush3.bf16.msra.mxu1 %v1276_v45  ;;  %v544_v45 = vld [vmem:[#allocation9 + $0x1c8] sm:$0xff]  ;;  %v633_v63 = vld [vmem:[#allocation9 + $0x210] sm:$0xff]  ;;  %v638_v9 = vld [vmem:[#allocation9 + $0x238] sm:$0xff] }
  0x65   :  { %1278 = vmatprep.subr.bf16.mxu1 %v1520_v1  ;;  %v1327_v46 = vpack.c.bf16 %v544_v45, %v543_v44  ;;  %v1342_v4 = vpack.c.bf16 %v634_v3, %v633_v63  ;;  %v640_v12 = vld [vmem:[#allocation9 + $0x248] sm:$0xff]  ;;  %v642_v15 = vld [vmem:[#allocation9 + $0x258] sm:$0xff]  ;;  %v731_v34 = vld [vmem:[#allocation9 + $0x2a0] sm:$0xff] }
  0x66   :  { %v644_v18 = vld [vmem:[#allocation9 + $0x268] sm:$0xff]  ;;  %v735_v39 = vld [vmem:[#allocation9 + $0x2c0] sm:$0xff]  ;;  %v737_v42 = vld [vmem:[#allocation9 + $0x2d0] sm:$0xff] }
  0x67   :  { %1259 = vmatpush3.bf16.msra.mxu0 %v1258_v27  ;;  %v739_v45 = vld [vmem:[#allocation9 + $0x2e0] sm:$0xff] }
  0x68   :  { %1260 = vmatprep.subr.bf16.mxu0 %v1520_v1  ;;  %1280 = vmatpush3.bf16.msra.mxu1 %v1279_v48  ;;  %v546_v48 = vld [vmem:[#allocation9 + $0x1d8] sm:$0xff] }
  0x69   :  { %1281 = vmatprep.subr.bf16.mxu1 %v1520_v1  ;;  %v1330_v49 = vpack.c.bf16 %v546_v48, %v545_v47  ;;  %v900_v48 = vld [vmem:[%s1737_s6 + $0x3] ss:$0 sm:$0xff] }
  0x6b   :  { %1262 = vmatpush3.bf16.msra.mxu0 %v1261_v30  ;;  %v454_v30 = vld [vmem:[#allocation9 + $0x178] sm:$0xff] }
  0x6c   :  { %1263 = vmatprep.subr.bf16.mxu0 %v1520_v1  ;;  %1283 = vmatpush3.bf16.msra.mxu1 %v1282_v51  ;;  %v1312_v31 = vpack.c.bf16 %v454_v30, %v453_v29  ;;  %v548_v51 = vld [vmem:[#allocation9 + $0x1e8] sm:$0xff]  ;;  %v729_v30 = vld [vmem:[#allocation9 + $0x290] sm:$0xff] }
  0x6d   :  { %1284 = vmatprep.subr.bf16.mxu1 %v1520_v1  ;;  %v1333_v52 = vpack.c.bf16 %v548_v51, %v547_v50  ;;  %v728_v29 = vld [vmem:[#allocation9 + $0x288] sm:$0xff] }
  0x6f   :  { %1265 = vmatpush3.bf16.msra.mxu0 %v1264_v33  ;;  %v536_v33 = vld [vmem:[#allocation9 + $0x188] sm:$0xff] }
  0x70   :  { %1290 = vmatprep.subr.bf16.mxu0 %v1520_v1  ;;  %1286 = vmatpush3.bf16.msra.mxu1 %v1285_v54  ;;  %v1315_v35 = vpack.c.bf16 %v536_v33, %v535_v32  ;;  %v730_v32 = vld [vmem:[#allocation9 + $0x298] sm:$0xff] }
  0x71   :  { %1287 = vmatprep.subr.bf16.mxu1 %v1520_v1  ;;  %v1366_v33 = vpack.c.bf16 %v730_v32, %v729_v30 }
  0x74   :  { %1289 = vmatpush3.bf16.msra.mxu1 %v1288_v0 }
  0x75   :  { %1314 = vmatprep.subr.bf16.mxu1 %v1520_v1 }
 0x123   :  { %v162_v55 = vpop.f32.mrb[0].mxu0 }
 0x124   :  { %v1019_v56 = vpop.f32.mrb[1].mxu0 }
 0x129   :  { %v236_v57 = vpop.f32.mrb[0].mxu1 }
 0x12a   :  { %v237_v59 = vadd.f32 %v236_v57, %v162_v55  ;;  %v1028_v60 = vpop.f32.mrb[1].mxu1 }
 0x12c   :  { %v247_v61 = vadd.f32 %v893_v58, %v237_v59  ;;  %v549_v58 = vld [vmem:[#allocation9 + $0x1f0] sm:$0xff]  ;;  %v550_v59 = vld [vmem:[#allocation9 + $0x1f8] sm:$0xff] }
 0x12d   :  { %v1336_v60 = vpack.c.bf16 %v550_v59, %v549_v58 }
 0x12e   :  { %1062 = vmatmul.mubr.f32.vlgmr.msra.gmra.mrb[2].mxu0 %v247_v61  ;;  %v631_v61 = vld [vmem:[#allocation9 + $0x200] sm:$0xff] }
 0x12f   :  { %1131 = vmatprep.mubr.msk.f32.mxu0 %vm1522_vm0, %v1521_v2  ;;  %1292 = vmatpush3.bf16.msra.mxu0 %v1291_v6  ;;  %v1339_v0 = vpack.c.bf16 %v632_v62, %v631_v61  ;;  %v636_v6 = vld [vmem:[#allocation9 + $0x228] sm:$0xff] }
 0x130   :  { %1293 = vmatprep.subr.bf16.mxu0 %v1520_v1  ;;  %v1345_v7 = vpack.c.bf16 %v636_v6, %v635_v5  ;;  %v906_v5 = vld [vmem:[#allocation2] ss:$0 sm:$0xff] }
 0x133   :  { %1295 = vmatpush3.bf16.msra.mxu0 %v1294_v8  ;;  %v637_v8 = vld [vmem:[#allocation9 + $0x230] sm:$0xff] }
 0x134   :  { %1296 = vmatprep.subr.bf16.mxu0 %v1520_v1  ;;  %v1348_v10 = vpack.c.bf16 %v638_v9, %v637_v8 }
 0x137   :  { %1298 = vmatpush3.bf16.msra.mxu0 %v1297_v11  ;;  %v639_v11 = vld [vmem:[#allocation9 + $0x240] sm:$0xff] }
 0x138   :  { %1299 = vmatprep.subr.bf16.mxu0 %v1520_v1  ;;  %v1351_v13 = vpack.c.bf16 %v640_v12, %v639_v11 }
 0x13b   :  { %1301 = vmatpush3.bf16.msra.mxu0 %v1300_v14  ;;  %v641_v14 = vld [vmem:[#allocation9 + $0x250] sm:$0xff] }
 0x13c   :  { %1302 = vmatprep.subr.bf16.mxu0 %v1520_v1  ;;  %v1354_v16 = vpack.c.bf16 %v642_v15, %v641_v14 }
 0x13f   :  { %1304 = vmatpush3.bf16.msra.mxu0 %v1303_v17  ;;  %v643_v17 = vld [vmem:[#allocation9 + $0x260] sm:$0xff] }
 0x140   :  { %1305 = vmatprep.subr.bf16.mxu0 %v1520_v1  ;;  %v1357_v19 = vpack.c.bf16 %v644_v18, %v643_v17 }
 0x143   :  { %1307 = vmatpush3.bf16.msra.mxu0 %v1306_v20  ;;  %v898_v20 = vld [vmem:[%s1737_s6 + $0x2] ss:$0 sm:$0xff] }
 0x144   :  { %1308 = vmatprep.subr.bf16.mxu0 %v1520_v1 }
 0x147   :  { %1310 = vmatpush3.bf16.msra.mxu0 %v1309_v23 }
 0x148   :  { %1311 = vmatprep.subr.bf16.mxu0 %v1520_v1 }
 0x14b   :  { %1313 = vmatpush3.bf16.msra.mxu0 %v1312_v31 }
 0x14c   :  { %1338 = vmatprep.subr.bf16.mxu0 %v1520_v1 }
 0x201   :  { %v337_v25 = vpop.f32.mrb[2].mxu0 }
 0x202   :  { %v338_v26 = vadd.f32 %v894_v24, %v337_v25  ;;  %v1063_v27 = vpop.f32.mrb[3].mxu0  ;;  %v645_v25 = vld [vmem:[#allocation9 + $0x270] sm:$0xff] }
 0x204   :  { %v341_v28 = vmax.f32 %v338_v26, 0.0  ;;  %v646_v26 = vld [vmem:[#allocation9 + $0x278] sm:$0xff] }
 0x205   :  { %v1360_v27 = vpack.c.bf16 %v646_v26, %v645_v25 }
 0x206   :  { %1097 = vmatmul.mubr.f32.vlgmr.msra.gmra.mrb[2].mxu1 %v341_v28  ;;  %v727_v28 = vld [vmem:[#allocation9 + $0x280] sm:$0xff] }
 0x207   :  { %1166 = vmatprep.mubr.msk.f32.mxu1 %vm1522_vm0, %v1521_v2  ;;  %1316 = vmatpush3.bf16.msra.mxu1 %v1315_v35  ;;  %v1363_v31 = vpack.c.bf16 %v728_v29, %v727_v28  ;;  %v732_v35 = vld [vmem:[#allocation9 + $0x2a8] sm:$0xff] }
 0x208   :  { %1317 = vmatprep.subr.bf16.mxu1 %v1520_v1  ;;  %v1369_v36 = vpack.c.bf16 %v732_v35, %v731_v34 }
 0x20b   :  { %1319 = vmatpush3.bf16.msra.mxu1 %v1318_v37  ;;  %v734_v37 = vld [vmem:[#allocation9 + $0x2b8] sm:$0xff] }
 0x20c   :  { %1320 = vmatprep.subr.bf16.mxu1 %v1520_v1 }
 0x20f   :  { %1322 = vmatpush3.bf16.msra.mxu1 %v1321_v40  ;;  %v736_v40 = vld [vmem:[#allocation9 + $0x2c8] sm:$0xff] }
 0x210   :  { %1323 = vmatprep.subr.bf16.mxu1 %v1520_v1  ;;  %v1375_v41 = vpack.c.bf16 %v736_v40, %v735_v39 }
 0x213   :  { %1325 = vmatpush3.bf16.msra.mxu1 %v1324_v43  ;;  %v738_v43 = vld [vmem:[#allocation9 + $0x2d8] sm:$0xff] }
 0x214   :  { %1326 = vmatprep.subr.bf16.mxu1 %v1520_v1  ;;  %v1378_v44 = vpack.c.bf16 %v738_v43, %v737_v42 }
 0x217   :  { %1328 = vmatpush3.bf16.msra.mxu1 %v1327_v46  ;;  %v740_v46 = vld [vmem:[#allocation9 + $0x2e8] sm:$0xff] }
 0x218   :  { %1329 = vmatprep.subr.bf16.mxu1 %v1520_v1  ;;  %v1381_v47 = vpack.c.bf16 %v740_v46, %v739_v45 }
 0x21b   :  { %1331 = vmatpush3.bf16.msra.mxu1 %v1330_v49 }
 0x21c   :  { %1332 = vmatprep.subr.bf16.mxu1 %v1520_v1 }
 0x21f   :  { %1334 = vmatpush3.bf16.msra.mxu1 %v1333_v52 }
 0x220   :  { %1335 = vmatprep.subr.bf16.mxu1 %v1520_v1 }
 0x223   :  { %1337 = vmatpush3.bf16.msra.mxu1 %v1336_v60  ;;  %v904_v60 = vld [vmem:[%s1737_s6 + $0x5] ss:$0 sm:$0xff] }
 0x224   :  { %1362 = vmatprep.subr.bf16.mxu1 %v1520_v1 }
 0x2d9   :  { %v433_v54 = vpop.f32.mrb[2].mxu1 }
 0x2da   :  { %v434_v55 = vadd.f32 %v896_v53, %v433_v54  ;;  %v1098_v56 = vpop.f32.mrb[3].mxu1  ;;  %v741_v53 = vld [vmem:[#allocation9 + $0x2f0] sm:$0xff]  ;;  %v742_v54 = vld [vmem:[#allocation9 + $0x2f8] sm:$0xff] }
 0x2db   :  { %v902_v56 = vld [vmem:[%s1737_s6 + $0x4] ss:$0 sm:$0xff]  ;;  %s1484_s6 = scalar_lea.vmem %s881_s27, 16 }
 0x2dc   :  { %v437_v57 = vmax.f32 %v434_v55, 0.0  ;;  %v1384_v55 = vpack.c.bf16 %v742_v54, %v741_v53  ;;  %p1485_p4 = scmp.ne.s32.totalorder %s881_s27, %s1484_s6  ;;  %p1490_p6 = scmp.lt.s32.totalorder %s1488_s28, %s1484_s6 }
 0x2de   :  { %1132 = vmatmul.mubr.f32.vlgmr.msra.gmra.mrb[4].mxu0 %v437_v57  ;;  %p1491_p7 = por %p1490_p6, %p1489_p5 }
 0x2df   :  { %1201 = vmatprep.mubr.msk.f32.mxu0 %vm1522_vm0, %v1521_v2  ;;  %1340 = vmatpush3.bf16.msra.mxu0 %v1339_v0  ;;  %v905_v0 = vld [vmem:[%s1738_s7] ss:$0 sm:$0xff] }
 0x2e0   :  { %1341 = vmatprep.subr.bf16.mxu0 %v1520_v1  ;;  %p1492_p8 = pnand %p1491_p7, %p1485_p4 }
 0x2e3   :  { %1343 = vmatpush3.bf16.msra.mxu0 %v1342_v4 }
 0x2e4   :  { %1344 = vmatprep.subr.bf16.mxu0 %v1520_v1 }
 0x2e7   :  { %1346 = vmatpush3.bf16.msra.mxu0 %v1345_v7 }
 0x2e8   :  { %1347 = vmatprep.subr.bf16.mxu0 %v1520_v1 }
 0x2eb   :  { %1349 = vmatpush3.bf16.msra.mxu0 %v1348_v10 }
 0x2ec   :  { %1350 = vmatprep.subr.bf16.mxu0 %v1520_v1 }
 0x2ef   :  { %1352 = vmatpush3.bf16.msra.mxu0 %v1351_v13 }
 0x2f0   :  { %1353 = vmatprep.subr.bf16.mxu0 %v1520_v1 }
 0x2f3   :  { %1355 = vmatpush3.bf16.msra.mxu0 %v1354_v16 }
 0x2f4   :  { %1356 = vmatprep.subr.bf16.mxu0 %v1520_v1 }
 0x2f7   :  { %1358 = vmatpush3.bf16.msra.mxu0 %v1357_v19 }
 0x2f8   :  { %1359 = vmatprep.subr.bf16.mxu0 %v1520_v1 }
 0x2fb   :  { %1361 = vmatpush3.bf16.msra.mxu0 %v1360_v27 }
 0x3b1   :  { %v529_v21 = vpop.f32.mrb[4].mxu0 }
 0x3b2   :  { %v530_v22 = vadd.f32 %v898_v20, %v529_v21  ;;  %v1133_v23 = vpop.f32.mrb[5].mxu0 }
 0x3b4   :  { %v533_v24 = vmax.f32 %v530_v22, 0.0 }
 0x3b6   :  { %1167 = vmatmul.mubr.f32.vlgmr.msra.gmra.mrb[4].mxu1 %v533_v24 }
 0x3b7   :  { %1236 = vmatprep.mubr.msk.f32.mxu1 %vm1522_vm0, %v1521_v2  ;;  %1364 = vmatpush3.bf16.msra.mxu1 %v1363_v31  ;;  %v733_v2 = vld [vmem:[#allocation9 + $0x2b0] sm:$0xff] }
 0x3b8   :  { %1365 = vmatprep.subr.bf16.mxu1 %v1520_v1  ;;  %v1372_v38 = vpack.c.bf16 %v734_v37, %v733_v2 }
 0x3bb   :  { %1367 = vmatpush3.bf16.msra.mxu1 %v1366_v33 }
 0x3bc   :  { %1368 = vmatprep.subr.bf16.mxu1 %v1520_v1 }
 0x3bf   :  { %1370 = vmatpush3.bf16.msra.mxu1 %v1369_v36 }
 0x3c0   :  { %1371 = vmatprep.subr.bf16.mxu1 %v1520_v1 }
 0x3c3   :  { %1373 = vmatpush3.bf16.msra.mxu1 %v1372_v38 }
 0x3c4   :  { %1374 = vmatprep.subr.bf16.mxu1 %v1520_v1 }
 0x3c7   :  { %1376 = vmatpush3.bf16.msra.mxu1 %v1375_v41 }
 0x3c8   :  { %1377 = vmatprep.subr.bf16.mxu1 %v1520_v1 }
 0x3cb   :  { %1379 = vmatpush3.bf16.msra.mxu1 %v1378_v44 }
 0x3cc   :  { %1380 = vmatprep.subr.bf16.mxu1 %v1520_v1 }
 0x3cf   :  { %1382 = vmatpush3.bf16.msra.mxu1 %v1381_v47 }
 0x3d0   :  { %1383 = vmatprep.subr.bf16.mxu1 %v1520_v1 }
 0x3d3   :  { %1385 = vmatpush3.bf16.msra.mxu1 %v1384_v55 }
 0x489   :  { %v625_v49 = vpop.f32.mrb[4].mxu1 }
 0x48a   :  { %v626_v50 = vadd.f32 %v900_v48, %v625_v49  ;;  %v1168_v51 = vpop.f32.mrb[5].mxu1 }
 0x48c   :  { %v629_v52 = vmax.f32 %v626_v50, 0.0 }
 0x48e   :  { %1202 = vmatmul.mubr.f32.vlgmr.msra.gmra.mrb[6].mxu0 %v629_v52 }
 0x561   :  { %v721_v57 = vpop.f32.mrb[6].mxu0 }
 0x562   :  { %v722_v58 = vadd.f32 %v902_v56, %v721_v57  ;;  %v1203_v1 = vpop.f32.mrb[7].mxu0 }
 0x564   :  { %v725_v59 = vmax.f32 %v722_v58, 0.0 }
 0x566   :  { %1237 = vmatmul.mubr.f32.vlgmr.msra.gmra.mrb[6].mxu1 %v725_v59 }
 0x639   :  { %v817_v61 = vpop.f32.mrb[6].mxu1 }
 0x63a   :  { %v818_v62 = vadd.f32 %v904_v60, %v817_v61  ;;  %v1238_v63 = vpop.f32.mrb[7].mxu1 }
 0x63c   :  { %v821_v3 = vmax.f32 %v818_v62, 0.0 }
 0x63e   :  { %v829_v4 = vmul.f32 %v905_v0, %v821_v3 }
 0x640   :  { %830 = vadd.xlane.f32.xlu0 %v829_v4 }
 0x6cd   :  { %v831_v6 = vpop.xlane.xlu0 %830 }
 0x6ce   :  { %v839_v7 = vadd.f32 %v906_v5, %v831_v6 }
 0x6d0   :  { %840 = vxpose.xlu0.b32.start.end [1/1] (short) (narrow) %v839_v7, 8 }
 0x750   :  { %v856_v8 = vpop.trf.xlu0 }
 0x751   :  { %873 = vst.msk [vmem:[#allocation11] sm:$0x1] %vm872_vm3, %v856_v8 }
 0x752   :  { %1495 = shalt.err (!%p1492_p8)
}
 0x753   :  { %s1496_s30 = scalar_lea.hbm %s1740_s9, 16 }
 0x754   :  { %p1497_p9 = scmp.ne.s32.totalorder %s1740_s9, %s1496_s30  ;;  %p1500_p10 = scmp.lt.u32.totalorder %s1496_s30, %s1740_s9 }
 0x756   :  { %p1502_p11 = pnand %p1500_p10, %p1497_p9 }
 0x758   :  { %1505 = shalt.err (!%p1502_p11)
}
 0x759   :  { %883 = dma.vmem_to_hbm [thread:$0]  %s881_s27, 16, %s1740_s9, [#allocation5]  }
 0x75a   :  { %1512 = dma.done.wait [#allocation5], 16  }
 0x75b   :  { %1513 = vsyncadd [#allocation5], 4294967280 }
 0x75c   :  { %887 = vsyncpa [#allocation4], 1 }
 0x75d   :  { %888 = vsyncpa [#allocation7], 1 }
 0x75e   :  { %889 = vsyncpa [#allocation10], 1 }
 0x75f   :  { %890 = vsyncpa [#allocation5], 1 }

</bundles_post_ra>
